<compile_context>
chip_gen: v7x
topology: tpu7x:2x2x1
jax: 0.10.0
libtpu: 0.0.40
codegen_flags: <defaults>
</compile_context>

<pallas_src>
import jax
import jax.numpy as jnp
import numpy as np
from jax.experimental import pallas as pl
from jax.experimental.pallas import tpu as pltpu

PAD_IDX = 0
EOS_IDX = 1
SOS_IDX = 2

NEG_INF = -10000.0


def _pick_tile(n, max_tile, align):
    """Largest divisor of n that is <= max_tile and a multiple of align (else n)."""
    if n <= max_tile:
        return n
    for t in range(max_tile, 0, -1):
        if n % t == 0 and t % align == 0:
            return t
    return n


def _crf_forward_kernel(y_ref, mask_ref, transT_ref, out_ref, score_ref):
    # y_ref:      (TT, K, TB)  emissions, time-major, batch on lanes
    # mask_ref:   (TT, TB)     0/1 mask
    # transT_ref: (K, K)       transT[j, i] = trans[i, j]   (j = previous tag)
    # out_ref:    (1, TB)      partition log-score, batch on lanes
    # score_ref:  (K, TB)      running forward score (VMEM accumulator)
    t_blk = pl.program_id(1)
    TT, K, TB = y_ref.shape

    @pl.when(t_blk == 0)
    def _init():
        row = jax.lax.broadcasted_iota(jnp.int32, (K, TB), 0)
        score_ref[...] = jnp.where(row == SOS_IDX,
                                   jnp.float32(0.0),
                                   jnp.float32(NEG_INF))

    # Hoisted out of the time loop (JAX does not CSE broadcast_in_dim).
    trans_b = transT_ref[...].astype(jnp.float32)[:, :, None]      # (K_j, K_i, 1)

    # NOTE: for K >= 128 the recurrence should be reformulated as a log-domain
    # MXU matmul (exp(trans) hoisted out of the T loop); at small K the
    # broadcast + leading-axis reduce below is the right regime.
    def body(t, score):                                             # score: (K, TB)
        emit = y_ref[t].astype(jnp.float32)                         # (K, TB)   Ref slice
        mask_t = mask_ref[pl.ds(t, 1), :]                           # (1, TB)   Ref slice
        # x[j, i, b] = score[j, b] + trans[i, j]
        x = score[:, None, :] + trans_b                             # (K_j, K_i, TB)
        m = jnp.max(x, axis=0)                                      # (K_i, TB)  leading-axis reduce (VPU)
        lse = m + jnp.log(jnp.sum(jnp.exp(x - m[None]), axis=0))    # (K_i, TB)
        new_score = lse + emit                                      # emission factored out of lse
        return jnp.where(mask_t > 0, new_score, score)              # single select, no float blend

    score = jax.lax.fori_loop(0, TT, body, score_ref[...], unroll=True)
    score_ref[...] = score

    @pl.when(t_blk == pl.num_programs(1) - 1)
    def _finalize():
        m = jnp.max(score, axis=0, keepdims=True)                   # (1, TB)
        out_ref[...] = m + jnp.log(
            jnp.sum(jnp.exp(score - m), axis=0, keepdims=True))     # lane-dense store


def crf_forward(y, mask, trans, *, batch_tile=None, time_tile=None):
    """y: (B, T, K) emissions, mask: (B, T) {0,1}, trans: (K, K). Returns (B,)."""
    B, T, K = y.shape
    TB = batch_tile if batch_tile is not None else _pick_tile(B, 256, 128)
    TT = time_tile if time_tile is not None else _pick_tile(T, 32, 8)
    assert B % TB == 0 and T % TT == 0

    # Batch-on-lanes layout; transition matrix pre-transposed (prev-tag leading).
    y_t = jnp.transpose(y, (1, 2, 0)).astype(jnp.float32)            # (T, K, B)
    mask_t = jnp.transpose(mask, (1, 0)).astype(jnp.float32)         # (T, B)
    trans_T = jnp.transpose(trans, (1, 0)).astype(jnp.float32)       # (K, K)

    out = pl.pallas_call(
        _crf_forward_kernel,
        out_shape=jax.ShapeDtypeStruct((1, B), jnp.float32),
        grid_spec=pltpu.PrefetchScalarGridSpec(
            num_scalar_prefetch=0,
            grid=(B // TB, T // TT),
            in_specs=[
                pl.BlockSpec((TT, K, TB), lambda b, t: (t, 0, b)),
                pl.BlockSpec((TT, TB), lambda b, t: (t, b)),
                pl.BlockSpec((K, K), lambda b, t: (0, 0)),
            ],
            out_specs=pl.BlockSpec((1, TB), lambda b, t: (0, b)),
            scratch_shapes=[pltpu.VMEM((K, TB), jnp.float32)],
        ),
        compiler_params=pltpu.CompilerParams(
            dimension_semantics=("parallel", "arbitrary")),
    )(y_t, mask_t, trans_T)
    return out[0]


def _log_sum_exp(x):
    m = jnp.max(x, axis=-1)
    return m + jnp.log(jnp.sum(jnp.exp(x - m[..., None]), axis=-1))


def crf_forward_ref(y, mask, trans):
    # Pure-JAX reference: literal transcription of the PyTorch crf.forward.
    B, T, K = y.shape
    score = jnp.full((B, K), NEG_INF, jnp.float32).at[:, SOS_IDX].set(0.0)
    for t in range(T):
        mask_t = mask[:, t][:, None]
        x = score[:, None, :] + y[:, t, :][:, :, None] + trans[None, :, :]
        score_t = _log_sum_exp(x)
        score = score_t * mask_t + score * (1.0 - mask_t)
    return _log_sum_exp(score)


def make_trans(key, num_tags):
    # deterministic equivalent of crf.__init__
    t = jax.random.normal(key, (num_tags, num_tags), jnp.float32)
    t = t.at[SOS_IDX, :].set(NEG_INF)
    t = t.at[:, EOS_IDX].set(NEG_INF)
    t = t.at[:, PAD_IDX].set(NEG_INF)
    t = t.at[PAD_IDX, :].set(NEG_INF)
    t = t.at[PAD_IDX, EOS_IDX].set(0.0)
    t = t.at[PAD_IDX, PAD_IDX].set(0.0)
    return t


if __name__ == "__main__":
    B, T, K = 8, 8, 8  # small shapes consistent with the module's forward
    key = jax.random.PRNGKey(0)
    k_trans, k_y, k_len = jax.random.split(key, 3)

    trans = make_trans(k_trans, K)
    y = jax.random.normal(k_y, (B, T, K), jnp.float32)
    # variable-length 0/1 mask (every sequence has length >= 1)
    lengths = jax.random.randint(k_len, (B,), 1, T + 1)
    mask = (jnp.arange(T)[None, :] < lengths[:, None]).astype(jnp.float32)

    out = crf_forward(y, mask, trans)
    jax.block_until_ready(out)

    ref = crf_forward_ref(y, mask, trans)
    np.testing.assert_allclose(np.asarray(out), np.asarray(ref),
                               rtol=1e-4, atol=1e-4)
    print("KERNEL_OK")
</pallas_src>

<mosaic_0001>
module attributes {stable_mosaic.version = 11 : i64} {
  func.func @_crf_forward_kernel(%arg0: i32, %arg1: i32, %arg2: memref<8x8x8xf32, #tpu.memory_space<vmem>>, %arg3: memref<8x8xf32, #tpu.memory_space<vmem>>, %arg4: memref<8x8xf32, #tpu.memory_space<vmem>>, %arg5: memref<1x8xf32, #tpu.memory_space<vmem>>, %arg6: memref<8x8xf32, #tpu.memory_space<vmem>>) attributes {dimension_semantics = [#tpu.dimension_semantics<parallel>, #tpu.dimension_semantics<arbitrary>], iteration_bounds = array<i64: 1, 1>, scalar_prefetch = 0 : i64, scratch_operands = 1 : i64, tpu.core_type = #tpu.core_type<tc>, window_params = [{transform_indices = @transform_0, window_bounds = array<i64: 8, 8, 8>}, {transform_indices = @transform_1, window_bounds = array<i64: 8, 8>}, {pipeline_mode = #tpu.pipeline_mode<synchronous>, transform_indices = @transform_2, window_bounds = array<i64: 8, 8>}, {transform_indices = @transform_3, window_bounds = array<i64: 1, 8>}]} {
    %c0_i32 = arith.constant 0 : i32
    %0 = arith.cmpi eq, %arg1, %c0_i32 : i32
    %1 = arith.extui %0 : i1 to i32
    %c0_i32_0 = arith.constant 0 : i32
    %2 = arith.cmpi ne, %1, %c0_i32_0 : i32
    scf.if %2 {
      %194 = tpu.iota {dimensions = array<i32: 0>} : vector<8x8xi32>
      %c2_i32_56 = arith.constant 2 : i32
      %195 = vector.broadcast %c2_i32_56 : i32 to vector<8x8xi32>
      %196 = arith.cmpi eq, %194, %195 : vector<8x8xi32>
      %cst_57 = arith.constant 0.000000e+00 : f32
      %cst_58 = arith.constant -1.000000e+04 : f32
      %197 = vector.broadcast %cst_57 : f32 to vector<8x8xf32>
      %198 = vector.broadcast %cst_58 : f32 to vector<8x8xf32>
      %199 = arith.select %196, %197, %198 : vector<8x8xi1>, vector<8x8xf32>
      %c0_59 = arith.constant 0 : index
      %c0_60 = arith.constant 0 : index
      %200 = vector.load %arg6[%c0_59, %c0_60] : memref<8x8xf32, #tpu.memory_space<vmem>>, vector<8x8xf32>
      tpu.vector_store %arg6[%c0_59, %c0_60], %199 {strides = array<i32>} : memref<8x8xf32, #tpu.memory_space<vmem>>, vector<8x8xf32>,
    } else {
    }
    %c0 = arith.constant 0 : index
    %c0_1 = arith.constant 0 : index
    %3 = vector.load %arg4[%c0, %c0_1] : memref<8x8xf32, #tpu.memory_space<vmem>>, vector<8x8xf32>
    %4 = vector.shape_cast %3 : vector<8x8xf32> to vector<8x8x1xf32>
    %c0_2 = arith.constant 0 : index
    %c0_3 = arith.constant 0 : index
    %5 = vector.load %arg6[%c0_2, %c0_3] : memref<8x8xf32, #tpu.memory_space<vmem>>, vector<8x8xf32>
    %c0_i32_4 = arith.constant 0 : i32
    %6 = arith.index_cast %c0_i32_4 : i32 to index
    %c0_5 = arith.constant 0 : index
    %c0_6 = arith.constant 0 : index
    %7 = vector.load %arg2[%6, %c0_5, %c0_6] : memref<8x8x8xf32, #tpu.memory_space<vmem>>, vector<1x8x8xf32>
    %8 = vector.shape_cast %7 : vector<1x8x8xf32> to vector<8x8xf32>
    %9 = arith.index_cast %c0_i32_4 : i32 to index
    %c0_7 = arith.constant 0 : index
    %10 = vector.load %arg3[%9, %c0_7] : memref<8x8xf32, #tpu.memory_space<vmem>>, vector<1x8xf32>
    %11 = vector.shape_cast %5 : vector<8x8xf32> to vector<8x1x8xf32>
    %12 = vector.broadcast %11 : vector<8x1x8xf32> to vector<8x8x8xf32>
    %13 = vector.broadcast %4 : vector<8x8x1xf32> to vector<8x8x8xf32>
    %14 = arith.addf %12, %13 : vector<8x8x8xf32>
    %cst = arith.constant dense<0xFF800000> : vector<8x8xf32>
    %15 = vector.multi_reduction <maximumf>, %14, %cst [0] : vector<8x8x8xf32> to vector<8x8xf32>
    %16 = vector.shape_cast %15 : vector<8x8xf32> to vector<1x8x8xf32>
    %17 = vector.broadcast %16 : vector<1x8x8xf32> to vector<8x8x8xf32>
    %18 = arith.subf %14, %17 : vector<8x8x8xf32>
    %19 = math.exp %18 : vector<8x8x8xf32>
    %cst_8 = arith.constant dense<0.000000e+00> : vector<8x8xf32>
    %20 = vector.multi_reduction <add>, %19, %cst_8 [0] : vector<8x8x8xf32> to vector<8x8xf32>
    %21 = math.log %20 : vector<8x8xf32>
    %22 = arith.addf %15, %21 : vector<8x8xf32>
    %23 = arith.addf %22, %8 : vector<8x8xf32>
    %cst_9 = arith.constant 0.000000e+00 : f32
    %24 = vector.broadcast %cst_9 : f32 to vector<1x8xf32>
    %25 = arith.cmpf ogt, %10, %24 : vector<1x8xf32>
    %26 = vector.shape_cast %25 : vector<1x8xi1> to vector<1x8xi1>
    %27 = vector.broadcast %26 : vector<1x8xi1> to vector<8x8xi1>
    %28 = arith.select %27, %23, %5 : vector<8x8xi1>, vector<8x8xf32>
    %c1_i32 = arith.constant 1 : i32
    %29 = arith.index_cast %c1_i32 : i32 to index
    %c0_10 = arith.constant 0 : index
    %c0_11 = arith.constant 0 : index
    %30 = vector.load %arg2[%29, %c0_10, %c0_11] : memref<8x8x8xf32, #tpu.memory_space<vmem>>, vector<1x8x8xf32>
    %31 = vector.shape_cast %30 : vector<1x8x8xf32> to vector<8x8xf32>
    %32 = arith.index_cast %c1_i32 : i32 to index
    %c0_12 = arith.constant 0 : index
    %33 = vector.load %arg3[%32, %c0_12] : memref<8x8xf32, #tpu.memory_space<vmem>>, vector<1x8xf32>
    %34 = vector.shape_cast %28 : vector<8x8xf32> to vector<8x1x8xf32>
    %35 = vector.broadcast %34 : vector<8x1x8xf32> to vector<8x8x8xf32>
    %36 = vector.broadcast %4 : vector<8x8x1xf32> to vector<8x8x8xf32>
    %37 = arith.addf %35, %36 : vector<8x8x8xf32>
    %cst_13 = arith.constant dense<0xFF800000> : vector<8x8xf32>
    %38 = vector.multi_reduction <maximumf>, %37, %cst_13 [0] : vector<8x8x8xf32> to vector<8x8xf32>
    %39 = vector.shape_cast %38 : vector<8x8xf32> to vector<1x8x8xf32>
    %40 = vector.broadcast %39 : vector<1x8x8xf32> to vector<8x8x8xf32>
    %41 = arith.subf %37, %40 : vector<8x8x8xf32>
    %42 = math.exp %41 : vector<8x8x8xf32>
    %cst_14 = arith.constant dense<0.000000e+00> : vector<8x8xf32>
    %43 = vector.multi_reduction <add>, %42, %cst_14 [0] : vector<8x8x8xf32> to vector<8x8xf32>
    %44 = math.log %43 : vector<8x8xf32>
    %45 = arith.addf %38, %44 : vector<8x8xf32>
    %46 = arith.addf %45, %31 : vector<8x8xf32>
    %cst_15 = arith.constant 0.000000e+00 : f32
    %47 = vector.broadcast %cst_15 : f32 to vector<1x8xf32>
    %48 = arith.cmpf ogt, %33, %47 : vector<1x8xf32>
    %49 = vector.shape_cast %48 : vector<1x8xi1> to vector<1x8xi1>
    %50 = vector.broadcast %49 : vector<1x8xi1> to vector<8x8xi1>
    %51 = arith.select %50, %46, %28 : vector<8x8xi1>, vector<8x8xf32>
    %c2_i32 = arith.constant 2 : i32
    %52 = arith.index_cast %c2_i32 : i32 to index
    %c0_16 = arith.constant 0 : index
    %c0_17 = arith.constant 0 : index
    %53 = vector.load %arg2[%52, %c0_16, %c0_17] : memref<8x8x8xf32, #tpu.memory_space<vmem>>, vector<1x8x8xf32>
    %54 = vector.shape_cast %53 : vector<1x8x8xf32> to vector<8x8xf32>
    %55 = arith.index_cast %c2_i32 : i32 to index
    %c0_18 = arith.constant 0 : index
    %56 = vector.load %arg3[%55, %c0_18] : memref<8x8xf32, #tpu.memory_space<vmem>>, vector<1x8xf32>
    %57 = vector.shape_cast %51 : vector<8x8xf32> to vector<8x1x8xf32>
    %58 = vector.broadcast %57 : vector<8x1x8xf32> to vector<8x8x8xf32>
    %59 = vector.broadcast %4 : vector<8x8x1xf32> to vector<8x8x8xf32>
    %60 = arith.addf %58, %59 : vector<8x8x8xf32>
    %cst_19 = arith.constant dense<0xFF800000> : vector<8x8xf32>
    %61 = vector.multi_reduction <maximumf>, %60, %cst_19 [0] : vector<8x8x8xf32> to vector<8x8xf32>
    %62 = vector.shape_cast %61 : vector<8x8xf32> to vector<1x8x8xf32>
    %63 = vector.broadcast %62 : vector<1x8x8xf32> to vector<8x8x8xf32>
    %64 = arith.subf %60, %63 : vector<8x8x8xf32>
    %65 = math.exp %64 : vector<8x8x8xf32>
    %cst_20 = arith.constant dense<0.000000e+00> : vector<8x8xf32>
    %66 = vector.multi_reduction <add>, %65, %cst_20 [0] : vector<8x8x8xf32> to vector<8x8xf32>
    %67 = math.log %66 : vector<8x8xf32>
    %68 = arith.addf %61, %67 : vector<8x8xf32>
    %69 = arith.addf %68, %54 : vector<8x8xf32>
    %cst_21 = arith.constant 0.000000e+00 : f32
    %70 = vector.broadcast %cst_21 : f32 to vector<1x8xf32>
    %71 = arith.cmpf ogt, %56, %70 : vector<1x8xf32>
    %72 = vector.shape_cast %71 : vector<1x8xi1> to vector<1x8xi1>
    %73 = vector.broadcast %72 : vector<1x8xi1> to vector<8x8xi1>
    %74 = arith.select %73, %69, %51 : vector<8x8xi1>, vector<8x8xf32>
    %c3_i32 = arith.constant 3 : i32
    %75 = arith.index_cast %c3_i32 : i32 to index
    %c0_22 = arith.constant 0 : index
    %c0_23 = arith.constant 0 : index
    %76 = vector.load %arg2[%75, %c0_22, %c0_23] : memref<8x8x8xf32, #tpu.memory_space<vmem>>, vector<1x8x8xf32>
    %77 = vector.shape_cast %76 : vector<1x8x8xf32> to vector<8x8xf32>
    %78 = arith.index_cast %c3_i32 : i32 to index
    %c0_24 = arith.constant 0 : index
    %79 = vector.load %arg3[%78, %c0_24] : memref<8x8xf32, #tpu.memory_space<vmem>>, vector<1x8xf32>
    %80 = vector.shape_cast %74 : vector<8x8xf32> to vector<8x1x8xf32>
    %81 = vector.broadcast %80 : vector<8x1x8xf32> to vector<8x8x8xf32>
    %82 = vector.broadcast %4 : vector<8x8x1xf32> to vector<8x8x8xf32>
    %83 = arith.addf %81, %82 : vector<8x8x8xf32>
    %cst_25 = arith.constant dense<0xFF800000> : vector<8x8xf32>
    %84 = vector.multi_reduction <maximumf>, %83, %cst_25 [0] : vector<8x8x8xf32> to vector<8x8xf32>
    %85 = vector.shape_cast %84 : vector<8x8xf32> to vector<1x8x8xf32>
    %86 = vector.broadcast %85 : vector<1x8x8xf32> to vector<8x8x8xf32>
    %87 = arith.subf %83, %86 : vector<8x8x8xf32>
    %88 = math.exp %87 : vector<8x8x8xf32>
    %cst_26 = arith.constant dense<0.000000e+00> : vector<8x8xf32>
    %89 = vector.multi_reduction <add>, %88, %cst_26 [0] : vector<8x8x8xf32> to vector<8x8xf32>
    %90 = math.log %89 : vector<8x8xf32>
    %91 = arith.addf %84, %90 : vector<8x8xf32>
    %92 = arith.addf %91, %77 : vector<8x8xf32>
    %cst_27 = arith.constant 0.000000e+00 : f32
    %93 = vector.broadcast %cst_27 : f32 to vector<1x8xf32>
    %94 = arith.cmpf ogt, %79, %93 : vector<1x8xf32>
    %95 = vector.shape_cast %94 : vector<1x8xi1> to vector<1x8xi1>
    %96 = vector.broadcast %95 : vector<1x8xi1> to vector<8x8xi1>
    %97 = arith.select %96, %92, %74 : vector<8x8xi1>, vector<8x8xf32>
    %c4_i32 = arith.constant 4 : i32
    %98 = arith.index_cast %c4_i32 : i32 to index
    %c0_28 = arith.constant 0 : index
    %c0_29 = arith.constant 0 : index
    %99 = vector.load %arg2[%98, %c0_28, %c0_29] : memref<8x8x8xf32, #tpu.memory_space<vmem>>, vector<1x8x8xf32>
    %100 = vector.shape_cast %99 : vector<1x8x8xf32> to vector<8x8xf32>
    %101 = arith.index_cast %c4_i32 : i32 to index
    %c0_30 = arith.constant 0 : index
    %102 = vector.load %arg3[%101, %c0_30] : memref<8x8xf32, #tpu.memory_space<vmem>>, vector<1x8xf32>
    %103 = vector.shape_cast %97 : vector<8x8xf32> to vector<8x1x8xf32>
    %104 = vector.broadcast %103 : vector<8x1x8xf32> to vector<8x8x8xf32>
    %105 = vector.broadcast %4 : vector<8x8x1xf32> to vector<8x8x8xf32>
    %106 = arith.addf %104, %105 : vector<8x8x8xf32>
    %cst_31 = arith.constant dense<0xFF800000> : vector<8x8xf32>
    %107 = vector.multi_reduction <maximumf>, %106, %cst_31 [0] : vector<8x8x8xf32> to vector<8x8xf32>
    %108 = vector.shape_cast %107 : vector<8x8xf32> to vector<1x8x8xf32>
    %109 = vector.broadcast %108 : vector<1x8x8xf32> to vector<8x8x8xf32>
    %110 = arith.subf %106, %109 : vector<8x8x8xf32>
    %111 = math.exp %110 : vector<8x8x8xf32>
    %cst_32 = arith.constant dense<0.000000e+00> : vector<8x8xf32>
    %112 = vector.multi_reduction <add>, %111, %cst_32 [0] : vector<8x8x8xf32> to vector<8x8xf32>
    %113 = math.log %112 : vector<8x8xf32>
    %114 = arith.addf %107, %113 : vector<8x8xf32>
    %115 = arith.addf %114, %100 : vector<8x8xf32>
    %cst_33 = arith.constant 0.000000e+00 : f32
    %116 = vector.broadcast %cst_33 : f32 to vector<1x8xf32>
    %117 = arith.cmpf ogt, %102, %116 : vector<1x8xf32>
    %118 = vector.shape_cast %117 : vector<1x8xi1> to vector<1x8xi1>
    %119 = vector.broadcast %118 : vector<1x8xi1> to vector<8x8xi1>
    %120 = arith.select %119, %115, %97 : vector<8x8xi1>, vector<8x8xf32>
    %c5_i32 = arith.constant 5 : i32
    %121 = arith.index_cast %c5_i32 : i32 to index
    %c0_34 = arith.constant 0 : index
    %c0_35 = arith.constant 0 : index
    %122 = vector.load %arg2[%121, %c0_34, %c0_35] : memref<8x8x8xf32, #tpu.memory_space<vmem>>, vector<1x8x8xf32>
    %123 = vector.shape_cast %122 : vector<1x8x8xf32> to vector<8x8xf32>
    %124 = arith.index_cast %c5_i32 : i32 to index
    %c0_36 = arith.constant 0 : index
    %125 = vector.load %arg3[%124, %c0_36] : memref<8x8xf32, #tpu.memory_space<vmem>>, vector<1x8xf32>
    %126 = vector.shape_cast %120 : vector<8x8xf32> to vector<8x1x8xf32>
    %127 = vector.broadcast %126 : vector<8x1x8xf32> to vector<8x8x8xf32>
    %128 = vector.broadcast %4 : vector<8x8x1xf32> to vector<8x8x8xf32>
    %129 = arith.addf %127, %128 : vector<8x8x8xf32>
    %cst_37 = arith.constant dense<0xFF800000> : vector<8x8xf32>
    %130 = vector.multi_reduction <maximumf>, %129, %cst_37 [0] : vector<8x8x8xf32> to vector<8x8xf32>
    %131 = vector.shape_cast %130 : vector<8x8xf32> to vector<1x8x8xf32>
    %132 = vector.broadcast %131 : vector<1x8x8xf32> to vector<8x8x8xf32>
    %133 = arith.subf %129, %132 : vector<8x8x8xf32>
    %134 = math.exp %133 : vector<8x8x8xf32>
    %cst_38 = arith.constant dense<0.000000e+00> : vector<8x8xf32>
    %135 = vector.multi_reduction <add>, %134, %cst_38 [0] : vector<8x8x8xf32> to vector<8x8xf32>
    %136 = math.log %135 : vector<8x8xf32>
    %137 = arith.addf %130, %136 : vector<8x8xf32>
    %138 = arith.addf %137, %123 : vector<8x8xf32>
    %cst_39 = arith.constant 0.000000e+00 : f32
    %139 = vector.broadcast %cst_39 : f32 to vector<1x8xf32>
    %140 = arith.cmpf ogt, %125, %139 : vector<1x8xf32>
    %141 = vector.shape_cast %140 : vector<1x8xi1> to vector<1x8xi1>
    %142 = vector.broadcast %141 : vector<1x8xi1> to vector<8x8xi1>
    %143 = arith.select %142, %138, %120 : vector<8x8xi1>, vector<8x8xf32>
    %c6_i32 = arith.constant 6 : i32
    %144 = arith.index_cast %c6_i32 : i32 to index
    %c0_40 = arith.constant 0 : index
    %c0_41 = arith.constant 0 : index
    %145 = vector.load %arg2[%144, %c0_40, %c0_41] : memref<8x8x8xf32, #tpu.memory_space<vmem>>, vector<1x8x8xf32>
    %146 = vector.shape_cast %145 : vector<1x8x8xf32> to vector<8x8xf32>
    %147 = arith.index_cast %c6_i32 : i32 to index
    %c0_42 = arith.constant 0 : index
    %148 = vector.load %arg3[%147, %c0_42] : memref<8x8xf32, #tpu.memory_space<vmem>>, vector<1x8xf32>
    %149 = vector.shape_cast %143 : vector<8x8xf32> to vector<8x1x8xf32>
    %150 = vector.broadcast %149 : vector<8x1x8xf32> to vector<8x8x8xf32>
    %151 = vector.broadcast %4 : vector<8x8x1xf32> to vector<8x8x8xf32>
    %152 = arith.addf %150, %151 : vector<8x8x8xf32>
    %cst_43 = arith.constant dense<0xFF800000> : vector<8x8xf32>
    %153 = vector.multi_reduction <maximumf>, %152, %cst_43 [0] : vector<8x8x8xf32> to vector<8x8xf32>
    %154 = vector.shape_cast %153 : vector<8x8xf32> to vector<1x8x8xf32>
    %155 = vector.broadcast %154 : vector<1x8x8xf32> to vector<8x8x8xf32>
    %156 = arith.subf %152, %155 : vector<8x8x8xf32>
    %157 = math.exp %156 : vector<8x8x8xf32>
    %cst_44 = arith.constant dense<0.000000e+00> : vector<8x8xf32>
    %158 = vector.multi_reduction <add>, %157, %cst_44 [0] : vector<8x8x8xf32> to vector<8x8xf32>
    %159 = math.log %158 : vector<8x8xf32>
    %160 = arith.addf %153, %159 : vector<8x8xf32>
    %161 = arith.addf %160, %146 : vector<8x8xf32>
    %cst_45 = arith.constant 0.000000e+00 : f32
    %162 = vector.broadcast %cst_45 : f32 to vector<1x8xf32>
    %163 = arith.cmpf ogt, %148, %162 : vector<1x8xf32>
    %164 = vector.shape_cast %163 : vector<1x8xi1> to vector<1x8xi1>
    %165 = vector.broadcast %164 : vector<1x8xi1> to vector<8x8xi1>
    %166 = arith.select %165, %161, %143 : vector<8x8xi1>, vector<8x8xf32>
    %c7_i32 = arith.constant 7 : i32
    %167 = arith.index_cast %c7_i32 : i32 to index
    %c0_46 = arith.constant 0 : index
    %c0_47 = arith.constant 0 : index
    %168 = vector.load %arg2[%167, %c0_46, %c0_47] : memref<8x8x8xf32, #tpu.memory_space<vmem>>, vector<1x8x8xf32>
    %169 = vector.shape_cast %168 : vector<1x8x8xf32> to vector<8x8xf32>
    %170 = arith.index_cast %c7_i32 : i32 to index
    %c0_48 = arith.constant 0 : index
    %171 = vector.load %arg3[%170, %c0_48] : memref<8x8xf32, #tpu.memory_space<vmem>>, vector<1x8xf32>
    %172 = vector.shape_cast %166 : vector<8x8xf32> to vector<8x1x8xf32>
    %173 = vector.broadcast %172 : vector<8x1x8xf32> to vector<8x8x8xf32>
    %174 = vector.broadcast %4 : vector<8x8x1xf32> to vector<8x8x8xf32>
    %175 = arith.addf %173, %174 : vector<8x8x8xf32>
    %cst_49 = arith.constant dense<0xFF800000> : vector<8x8xf32>
    %176 = vector.multi_reduction <maximumf>, %175, %cst_49 [0] : vector<8x8x8xf32> to vector<8x8xf32>
    %177 = vector.shape_cast %176 : vector<8x8xf32> to vector<1x8x8xf32>
    %178 = vector.broadcast %177 : vector<1x8x8xf32> to vector<8x8x8xf32>
    %179 = arith.subf %175, %178 : vector<8x8x8xf32>
    %180 = math.exp %179 : vector<8x8x8xf32>
    %cst_50 = arith.constant dense<0.000000e+00> : vector<8x8xf32>
    %181 = vector.multi_reduction <add>, %180, %cst_50 [0] : vector<8x8x8xf32> to vector<8x8xf32>
    %182 = math.log %181 : vector<8x8xf32>
    %183 = arith.addf %176, %182 : vector<8x8xf32>
    %184 = arith.addf %183, %169 : vector<8x8xf32>
    %cst_51 = arith.constant 0.000000e+00 : f32
    %185 = vector.broadcast %cst_51 : f32 to vector<1x8xf32>
    %186 = arith.cmpf ogt, %171, %185 : vector<1x8xf32>
    %187 = vector.shape_cast %186 : vector<1x8xi1> to vector<1x8xi1>
    %188 = vector.broadcast %187 : vector<1x8xi1> to vector<8x8xi1>
    %189 = arith.select %188, %184, %166 : vector<8x8xi1>, vector<8x8xf32>
    %c8_i32 = arith.constant 8 : i32
    %c0_52 = arith.constant 0 : index
    %c0_53 = arith.constant 0 : index
    %190 = vector.load %arg6[%c0_52, %c0_53] : memref<8x8xf32, #tpu.memory_space<vmem>>, vector<8x8xf32>
    tpu.vector_store %arg6[%c0_52, %c0_53], %189 {strides = array<i32>} : memref<8x8xf32, #tpu.memory_space<vmem>>, vector<8x8xf32>,
    %c0_i32_54 = arith.constant 0 : i32
    %191 = arith.cmpi eq, %arg1, %c0_i32_54 : i32
    %192 = arith.extui %191 : i1 to i32
    %c0_i32_55 = arith.constant 0 : i32
    %193 = arith.cmpi ne, %192, %c0_i32_55 : i32
    scf.if %193 {
      %cst_56 = arith.constant dense<0xFF800000> : vector<8xf32>
      %194 = vector.multi_reduction <maximumf>, %189, %cst_56 [0] : vector<8x8xf32> to vector<8xf32>
      %195 = vector.shape_cast %194 : vector<8xf32> to vector<1x8xf32>
      %196 = vector.broadcast %195 : vector<1x8xf32> to vector<8x8xf32>
      %197 = arith.subf %189, %196 : vector<8x8xf32>
      %198 = math.exp %197 : vector<8x8xf32>
      %cst_57 = arith.constant dense<0.000000e+00> : vector<8xf32>
      %199 = vector.multi_reduction <add>, %198, %cst_57 [0] : vector<8x8xf32> to vector<8xf32>
      %200 = vector.shape_cast %199 : vector<8xf32> to vector<1x8xf32>
      %201 = math.log %200 : vector<1x8xf32>
      %202 = arith.addf %195, %201 : vector<1x8xf32>
      %c0_58 = arith.constant 0 : index
      %c0_59 = arith.constant 0 : index
      %203 = vector.load %arg5[%c0_58, %c0_59] : memref<1x8xf32, #tpu.memory_space<vmem>>, vector<1x8xf32>
      tpu.vector_store %arg5[%c0_58, %c0_59], %202 {strides = array<i32>} : memref<1x8xf32, #tpu.memory_space<vmem>>, vector<1x8xf32>,
    } else {
    }
    return
  }
  func.func @transform_0(%arg0: i32, %arg1: i32) -> (i32, i32, i32) {
    %c0_i32 = arith.constant 0 : i32
    %c0_i32_0 = arith.constant 0 : i32
    return %arg1, %c0_i32, %arg0 : i32, i32, i32
  }
  func.func @transform_1(%arg0: i32, %arg1: i32) -> (i32, i32) {
    %c0_i32 = arith.constant 0 : i32
    return %arg1, %arg0 : i32, i32
  }
  func.func @transform_2(%arg0: i32, %arg1: i32) -> (i32, i32) {
    %c0_i32 = arith.constant 0 : i32
    %c0_i32_0 = arith.constant 0 : i32
    %c0_i32_1 = arith.constant 0 : i32
    return %c0_i32, %c0_i32_0 : i32, i32
  }
  func.func @transform_3(%arg0: i32, %arg1: i32) -> (i32, i32) {
    %c0_i32 = arith.constant 0 : i32
    %c0_i32_0 = arith.constant 0 : i32
    return %c0_i32, %arg0 : i32, i32
  }
}

</mosaic_0001>

<bundles_post_ra>
// kernel: tpu_custom_call.1
= control target key start
LH: loop header
LB: loop body
LE: loop exit
PB: predicated region body
PF: predicated region fallthrough
CT: control target
= control target key end

     0   :  { %8 = vsyncpa [#allocation4], 0  ;;  %s2227_s0 = inlined_call_operand.hbm [shape: f32[8,8,8], index: 0, kind: input, shape index: {}]   ;;  %s2228_s1 = inlined_call_operand.hbm [shape: f32[8,8], index: 1, kind: input, shape index: {}]   ;;  %s2229_s2 = inlined_call_operand.hbm [shape: f32[8,8], index: 2, kind: input, shape index: {}]   ;;  %s2230_s3 = inlined_call_operand.hbm [shape: f32[1,8], index: 3, kind: output, shape index: {}]  }
   0x1   :  { %9 = vsyncpa [#allocation7], 0 }
   0x2   :  { %10 = vsyncpa [#allocation5], 0  ;;  %s1750_s12 = smov [#allocation6]   ;;  %s1751_s14 = smov [#allocation3]  }
   0x3   :  { %s29_s13 = sshll.u32 %s1750_s12, 4  ;;  %s16_s15 = sshll.u32 %s1751_s14, 4  ;;  %s30_s13 = int_to_ptr.vmem [resolvable:$true] %s29_s13  ;;  %s1779_s15 = int_to_ptr.vmem [resolvable:$true] %s16_s15 }
   0x4   :  { %s1656_s18 = scalar_lea.hbm %s2228_s1, 128 }
   0x5   :  { %p1657_p0 = scmp.ne.s32.totalorder %s2228_s1, %s1656_s18  ;;  %p1660_p1 = scmp.lt.u32.totalorder %s1656_s18, %s2228_s1 }
   0x7   :  { %p1662_p2 = pnand %p1660_p1, %p1657_p0 }
   0x9   :  { %1665 = shalt.err (!%p1662_p2)
}
   0xa   :  { %s1666_s23 = scalar_lea.vmem %s30_s13, 128  ;;  %p1671_p4 = scmp.lt.s32.totalorder %s30_s13, %s30_s13 }
   0xb   :  { %p1667_p3 = scmp.ne.s32.totalorder %s30_s13, %s1666_s23  ;;  %p1672_p5 = scmp.lt.s32.totalorder %s1666_s23, %s1666_s23 }
   0xd   :  { %p1673_p6 = por %p1672_p5, %p1671_p4 }
   0xf   :  { %p1674_p7 = pnand %p1673_p6, %p1667_p3 }
  0x11   :  { %1677 = shalt.err (!%p1674_p7)
}
  0x12   :  { %32 = dma.hbm_to_vmem [thread:$0]  %s2228_s1, 128, %s30_s13, [#allocation7]  }
  0x13   :  { %s1678_s28 = scalar_lea.hbm %s2227_s0, 1024 }
  0x14   :  { %p1679_p8 = scmp.ne.s32.totalorder %s2227_s0, %s1678_s28  ;;  %p1682_p9 = scmp.lt.u32.totalorder %s1678_s28, %s2227_s0 }
  0x16   :  { %p1684_p10 = pnand %p1682_p9, %p1679_p8 }
  0x18   :  { %1687 = shalt.err (!%p1684_p10)
}
  0x19   :  { %s1688_s6 = scalar_lea.vmem %s1779_s15, 1024  ;;  %p1693_p12 = scmp.lt.s32.totalorder %s1779_s15, %s1779_s15 }
  0x1a   :  { %p1689_p11 = scmp.ne.s32.totalorder %s1779_s15, %s1688_s6  ;;  %p1694_p13 = scmp.lt.s32.totalorder %s1688_s6, %s1688_s6 }
  0x1c   :  { %p1695_p0 = por %p1694_p13, %p1693_p12 }
  0x1e   :  { %p1696_p1 = pnand %p1695_p0, %p1689_p11 }
  0x20   :  { %1699 = shalt.err (!%p1696_p1)
}
  0x21   :  { %s1752_s1 = smov 128   ;;  %s1753_s7 = smov 8  }
  0x22   :  { %22 = dma.hbm_to_vmem [thread:$0]  %s2227_s0, 1024, %s1779_s15, [#allocation4], %s1752_s1, %s1752_s1, %s1753_s7  }
  0x23   :  { %s1754_s10 = smov [#allocation8]   ;;  %s1700_s14 = scalar_lea.hbm %s2229_s2, 128 }
  0x24   :  { %s39_s11 = sshll.u32 %s1754_s10, 4  ;;  %p1701_p2 = scmp.ne.s32.totalorder %s2229_s2, %s1700_s14  ;;  %s40_s11 = int_to_ptr.vmem [resolvable:$true] %s39_s11 }
  0x25   :  { %p1704_p3 = scmp.lt.u32.totalorder %s1700_s14, %s2229_s2 }
  0x27   :  { %p1706_p4 = pnand %p1704_p3, %p1701_p2 }
  0x29   :  { %1709 = shalt.err (!%p1706_p4)
}
  0x2a   :  { %s1710_s20 = scalar_lea.vmem %s40_s11, 128  ;;  %p1715_p6 = scmp.lt.s32.totalorder %s40_s11, %s40_s11 }
  0x2b   :  { %p1711_p5 = scmp.ne.s32.totalorder %s40_s11, %s1710_s20  ;;  %p1716_p7 = scmp.lt.s32.totalorder %s1710_s20, %s1710_s20 }
  0x2d   :  { %p1717_p8 = por %p1716_p7, %p1715_p6 }
  0x2f   :  { %p1718_p9 = pnand %p1717_p8, %p1711_p5 }
  0x31   :  { %1721 = shalt.err (!%p1718_p9)
}
  0x32   :  { %42 = dma.hbm_to_vmem [thread:$0]  %s2229_s2, 128, %s40_s11, [#allocation7]  }
  0x33   :  { %1744 = dma.done.wait [#allocation4], 1024  }
  0x34   :  { %1745 = vsyncadd [#allocation4], 4294966272 }
  0x35   :  { %1746 = dma.done.wait [#allocation7], 256  }
  0x36   :  { %1747 = vsyncadd [#allocation7], 4294967040  ;;  %v56_v0 = vlaneseq  ;;  %vm60_vm0 = vcmask 64512   ;;  %v62_v6 = vld [vmem:[#allocation8] sm:$0xff]  ;;  %v1755_v7 = vmov -10000.0   ;;  %s1758_s2 = smov [#allocation9]  }
  0x37   :  { %v1756_v21 = vmov 1966171168   ;;  %s1488_s21 = sshll.u32 %s1758_s2, 4  ;;  %s1489_s21 = int_to_ptr.vmem [resolvable:$true] %s1488_s21 }
  0x38   :  { %v57_v1 = vshrl.u32 %v56_v0, 7  ;;  %v125_v22 = vunpack.c.l.s4 %v1756_v21  ;;  %s1722_s22 = scalar_lea.vmem %s1489_s21, 16  ;;  %s1726_s23 = scalar_lea.vmem %s1489_s21, 32 }
  0x39   :  { %p1723_p10 = scmp.ne.s32.totalorder %s1489_s21, %s1722_s22  ;;  %p1727_p11 = scmp.lt.s32.totalorder %s1489_s21, %s1489_s21 }
  0x3a   :  { %v1822_v2 = vsub.s32 0, %v57_v1  ;;  %v79_v3 = vsub.s32 2, %v57_v1  ;;  %v86_v4 = vsub.s32 3, %v57_v1  ;;  %v72_v5 = vsub.s32 1, %v57_v1  ;;  %p1728_p12 = scmp.lt.s32.totalorder %s1726_s23, %s1722_s22 }
  0x3b   :  { %vm58_vm1 = vcmp.eq.s32.totalorder %v57_v1, 2  ;;  %v100_v13 = vsub.s32 5, %v57_v1  ;;  %v93_v14 = vsub.s32 4, %v57_v1  ;;  %v114_v17 = vsub.s32 7, %v57_v1 }
  0x3c   :  { %v59_v8 = vsel %vm58_vm1, 0.0, %v1755_v7  ;;  %v80_v9 = vrot.slane %v62_v6, %v79_v3  ;;  %v66_v10 = vrot.slane %v62_v6, %v1822_v2  ;;  %v87_v11 = vrot.slane %v62_v6, %v86_v4  ;;  %p1729_p13 = por %p1728_p12, %p1727_p11 }
  0x3d   :  { %61 = vst.msk [vmem:[#allocation2] sm:$0xff] %vm60_vm0, %v59_v8  ;;  %v73_v12 = vrot.slane %v62_v6, %v72_v5  ;;  %v101_v15 = vrot.slane %v62_v6, %v100_v13  ;;  %v94_v16 = vrot.slane %v62_v6, %v93_v14  ;;  %v107_v18 = vsub.s32 6, %v57_v1 }
  0x3e   :  { %82 = vbcast.lane.b32.xlu1 %v80_v9, 256  ;;  %68 = vbcast.lane.b32.xlu0 %v66_v10, 256  ;;  %v115_v19 = vrot.slane %v62_v6, %v114_v17  ;;  %v126_v23 = vunpack.c.0.s8 %v125_v22  ;;  %p1730_p0 = pnand %p1729_p13, %p1723_p10 }
  0x3f   :  { %v108_v20 = vrot.slane %v62_v6, %v107_v18 }
  0x40   :  { %v1828_v25 = vsub.s32 %v126_v23, %v57_v1 }
  0x42   :  { %89 = vbcast.lane.b32.xlu1 %v87_v11, 256  ;;  %75 = vbcast.lane.b32.xlu0 %v73_v12, 256 }
  0x44   :  { %v1826_v24 = vld [vmem:[#allocation2] sm:$0xff] }
  0x45   :  { %v123_v26 = vcombine.high %v1826_v24, %v1826_v24  ;;  %v130_v27 = vrot.slane %v1826_v24, %v1828_v25 }
  0x46   :  { %103 = vbcast.lane.b32.xlu1 %v101_v15, 256  ;;  %96 = vbcast.lane.b32.xlu0 %v94_v16, 256 }
  0x47   :  { %v137_v28 = vrot.slane %v123_v26, %v1828_v25  ;;  %v138_v29 = vcombine.high %v130_v27, %v130_v27  ;;  %v146_v31 = vrot.slane %v130_v27, %v1828_v25 }
  0x49   :  { %v139_v30 = vcombine.high %v137_v28, %v137_v28  ;;  %v160_v32 = vrot.slane %v138_v29, %v1828_v25  ;;  %v153_v36 = vrot.slane %v137_v28, %v1828_v25  ;;  %v168_v37 = vcombine.high %v146_v31, %v146_v31 }
  0x4a   :  { %117 = vbcast.lane.b32.xlu1 %v115_v19, 256  ;;  %110 = vbcast.lane.b32.xlu0 %v108_v20, 256  ;;  %v175_v43 = vrot.slane %v146_v31, %v1822_v2 }
  0x4b   :  { %v167_v35 = vrot.slane %v139_v30, %v1828_v25  ;;  %v170_v38 = vcombine.high %v160_v32, %v160_v32  ;;  %v169_v42 = vcombine.high %v153_v36, %v153_v36  ;;  %v179_v44 = vrot.slane %v160_v32, %v1822_v2 }
  0x4c   :  { %v191_v46 = vrot.slane %v153_v36, %v1822_v2  ;;  %v183_v47 = vrot.slane %v168_v37, %v1822_v2 }
  0x4d   :  { %v171_v41 = vcombine.high %v167_v35, %v167_v35  ;;  %v195_v45 = vrot.slane %v167_v35, %v1822_v2  ;;  %v187_v48 = vrot.slane %v170_v38, %v1822_v2  ;;  %v199_v52 = vrot.slane %v169_v42, %v1822_v2 }
  0x4f   :  { %v203_v51 = vrot.slane %v171_v41, %v1822_v2 }
  0xb0   :  { %v1837_v33 = vpop.permute.xlu1 %82  ;;  %v1839_v34 = vpop.permute.xlu0 %68 }
  0xb1   :  { %v212_v53 = vadd.f32 %v175_v43, %v1839_v34  ;;  %v214_v57 = vadd.f32 %v183_v47, %v1837_v33 }
  0xb3   :  { %v221_v63 = vsel %vm60_vm0, %v212_v53, -inf  ;;  %v223_v8 = vsel %vm60_vm0, %v214_v57, -inf }
  0xb4   :  { %v1843_v39 = vpop.permute.xlu1 %89  ;;  %v1845_v40 = vpop.permute.xlu0 %75 }
  0xb5   :  { %v213_v54 = vadd.f32 %v179_v44, %v1845_v40  ;;  %v215_v58 = vadd.f32 %v187_v48, %v1843_v39 }
  0xb7   :  { %v222_v0 = vsel %vm60_vm0, %v213_v54, -inf  ;;  %v224_v6 = vsel %vm60_vm0, %v215_v58, -inf }
  0xb8   :  { %v1853_v49 = vpop.permute.xlu1 %103  ;;  %v1855_v50 = vpop.permute.xlu0 %96 }
  0xb9   :  { %v217_v55 = vadd.f32 %v195_v45, %v1853_v49  ;;  %v216_v56 = vadd.f32 %v191_v46, %v1855_v50 }
  0xbb   :  { %v227_v59 = vsel %vm60_vm0, %v217_v55, -inf  ;;  %v225_v60 = vsel %vm60_vm0, %v216_v56, -inf }
  0xbc   :  { %v1867_v61 = vpop.permute.xlu1 %117  ;;  %v1869_v62 = vpop.permute.xlu0 %110  ;;  %v228_v4 = vmax.f32 %v222_v0, %v227_v59  ;;  %v226_v5 = vmax.f32 %v221_v63, %v225_v60  ;;  %v121_v0 = vld [vmem:[#allocation6] sm:$0x1] }
  0xbd   :  { %v219_v1 = vadd.f32 %v203_v51, %v1867_v61  ;;  %v218_v3 = vadd.f32 %v199_v52, %v1869_v62  ;;  %vm279_vm2 = vcmp.gt.f32.partialorder %v121_v0, 0.0 }
  0xbe   :  { %v233_v12 = vmax.f32 %v226_v5, %v228_v4 }
  0xbf   :  { %v231_v7 = vsel %vm60_vm0, %v219_v1, -inf  ;;  %v229_v9 = vsel %vm60_vm0, %v218_v3, -inf }
  0xc0   :  { %v232_v10 = vmax.f32 %v224_v6, %v231_v7  ;;  %v230_v11 = vmax.f32 %v223_v8, %v229_v9  ;;  %v120_v7 = vld [vmem:[#allocation3] sm:$0xff] }
  0xc2   :  { %v234_v13 = vmax.f32 %v230_v11, %v232_v10 }
  0xc4   :  { %v235_v14 = vmax.f32 %v233_v12, %v234_v13 }
  0xc6   :  { %v236_v15 = vsub.f32 %v212_v53, %v235_v14  ;;  %v237_v16 = vsub.f32 %v213_v54, %v235_v14  ;;  %v238_v17 = vsub.f32 %v214_v57, %v235_v14  ;;  %v239_v18 = vsub.f32 %v215_v58, %v235_v14 }
  0xc7   :  { %v240_v19 = vsub.f32 %v216_v56, %v235_v14  ;;  %v241_v23 = vsub.f32 %v217_v55, %v235_v14  ;;  %v242_v27 = vsub.f32 %v218_v3, %v235_v14  ;;  %v243_v29 = vsub.f32 %v219_v1, %v235_v14 }
  0xc8   :  { %v244_v20 = vmul.f32 1.442695, %v236_v15  ;;  %v246_v21 = vmul.f32 1.442695, %v237_v16  ;;  %v248_v22 = vmul.f32 1.442695, %v238_v17 }
  0xc9   :  { %v250_v26 = vmul.f32 1.442695, %v239_v18  ;;  %v252_v28 = vmul.f32 1.442695, %v240_v19  ;;  %v254_v30 = vmul.f32 1.442695, %v241_v23 }
  0xca   :  { %1508 = vpow2.f32 %v244_v20  ;;  %v256_v31 = vmul.f32 1.442695, %v242_v27  ;;  %v258_v32 = vmul.f32 1.442695, %v243_v29  ;;  %v1757_v1 = vmov 0  }
  0xcb   :  { %1510 = vpow2.f32 %v246_v21  ;;  %v280_v3 = vsel %vm279_vm2, 1, %v1757_v1 }
  0xcc   :  { %1512 = vpow2.f32 %v248_v22  ;;  %v284_v5 = vrot.slane %v280_v3, %v1822_v2 }
  0xcd   :  { %1514 = vpow2.f32 %v250_v26 }
  0xce   :  { %1516 = vpow2.f32 %v252_v28  ;;  %vm285_vm3 = vcmp.eq.s32.totalorder %v284_v5, 1 }
  0xcf   :  { %1518 = vpow2.f32 %v254_v30 }
  0xd0   :  { %1520 = vpow2.f32 %v256_v31 }
  0xd1   :  { %1522 = vpow2.f32 %v258_v32 }
  0xd4   :  { %v1509_v35 = vpop.eup %1508 }
  0xd5   :  { %v1511_v36 = vpop.eup %1510  ;;  %v260_v37 = vsel %vm60_vm0, %v1509_v35, 0.0 }
  0xd6   :  { %v1513_v38 = vpop.eup %1512  ;;  %v261_v41 = vsel %vm60_vm0, %v1511_v36, 0.0 }
  0xd7   :  { %v1515_v42 = vpop.eup %1514  ;;  %v262_v43 = vadd.f32 %v261_v41, %v260_v37  ;;  %v263_v44 = vsel %vm60_vm0, %v1513_v38, 0.0 }
  0xd8   :  { %v1517_v45 = vpop.eup %1516  ;;  %v265_v47 = vsel %vm60_vm0, %v1515_v42, 0.0 }
  0xd9   :  { %v264_v46 = vadd.f32 %v263_v44, %v262_v43  ;;  %v1519_v48 = vpop.eup %1518  ;;  %v267_v52 = vsel %vm60_vm0, %v1517_v45, 0.0 }
  0xda   :  { %v1521_v53 = vpop.eup %1520  ;;  %v269_v55 = vsel %vm60_vm0, %v1519_v48, 0.0 }
  0xdb   :  { %v266_v51 = vadd.f32 %v265_v47, %v264_v46  ;;  %v1523_v56 = vpop.eup %1522  ;;  %v271_v58 = vsel %vm60_vm0, %v1521_v53, 0.0 }
  0xdc   :  { %v273_v60 = vsel %vm60_vm0, %v1523_v56, 0.0 }
  0xdd   :  { %v268_v54 = vadd.f32 %v267_v52, %v266_v51 }
  0xdf   :  { %v270_v57 = vadd.f32 %v269_v55, %v268_v54 }
  0xe1   :  { %v272_v59 = vadd.f32 %v271_v58, %v270_v57 }
  0xe3   :  { %v274_v63 = vadd.f32 %v273_v60, %v272_v59 }
  0xe5   :  { %1524 = vlog2.f32 %v274_v63 }
  0xef   :  { %v1525_v4 = vpop.eup %1524 }
  0xf0   :  { %v276_v6 = vmul.f32 0.6931472, %v1525_v4 }
  0xf2   :  { %v277_v8 = vadd.f32 %v276_v6, %v235_v14 }
  0xf4   :  { %v278_v9 = vadd.f32 %v277_v8, %v120_v7 }
  0xf6   :  { %v1890_v10 = vsel %vm285_vm3, %v278_v9, %v1826_v24  ;;  %vm1480_vm3 = vcmask 57344  }
  0xf7   :  { %v291_v11 = vcombine.high %v1890_v10, %v1890_v10  ;;  %v298_v12 = vrot.slane %v1890_v10, %v1828_v25 }
  0xf9   :  { %v305_v13 = vrot.slane %v291_v11, %v1828_v25  ;;  %v306_v15 = vcombine.high %v298_v12, %v298_v12  ;;  %v314_v16 = vrot.slane %v298_v12, %v1828_v25 }
  0xfb   :  { %v307_v17 = vcombine.high %v305_v13, %v305_v13  ;;  %v321_v18 = vrot.slane %v305_v13, %v1828_v25  ;;  %v328_v14 = vrot.slane %v306_v15, %v1828_v25  ;;  %v336_v19 = vcombine.high %v314_v16, %v314_v16 }
  0xfc   :  { %v343_v24 = vrot.slane %v314_v16, %v1822_v2 }
  0xfd   :  { %v335_v20 = vrot.slane %v307_v17, %v1828_v25  ;;  %v337_v21 = vcombine.high %v321_v18, %v321_v18  ;;  %v338_v22 = vcombine.high %v328_v14, %v328_v14  ;;  %v347_v23 = vrot.slane %v328_v14, %v1822_v2 }
  0xfe   :  { %v351_v26 = vrot.slane %v336_v19, %v1822_v2  ;;  %v359_v27 = vrot.slane %v321_v18, %v1822_v2  ;;  %v380_v32 = vadd.f32 %v343_v24, %v1839_v34 }
  0xff   :  { %v339_v28 = vcombine.high %v335_v20, %v335_v20  ;;  %v355_v29 = vrot.slane %v338_v22, %v1822_v2  ;;  %v363_v30 = vrot.slane %v335_v20, %v1822_v2  ;;  %v367_v31 = vrot.slane %v337_v21, %v1822_v2 }
 0x100   :  { %v381_v35 = vadd.f32 %v347_v23, %v1845_v40  ;;  %v382_v36 = vadd.f32 %v351_v26, %v1837_v33  ;;  %v384_v37 = vadd.f32 %v359_v27, %v1855_v50  ;;  %v388_v52 = vsel %vm60_vm0, %v380_v32, -inf }
 0x101   :  { %v371_v38 = vrot.slane %v339_v28, %v1822_v2  ;;  %v383_v41 = vadd.f32 %v355_v29, %v1843_v39  ;;  %v385_v42 = vadd.f32 %v363_v30, %v1853_v49  ;;  %v386_v43 = vadd.f32 %v367_v31, %v1869_v62 }
 0x102   :  { %v389_v45 = vsel %vm60_vm0, %v381_v35, -inf  ;;  %v392_v46 = vsel %vm60_vm0, %v384_v37, -inf  ;;  %v390_v53 = vsel %vm60_vm0, %v382_v36, -inf }
 0x103   :  { %v387_v44 = vadd.f32 %v371_v38, %v1867_v61  ;;  %v394_v47 = vsel %vm60_vm0, %v385_v42, -inf  ;;  %v396_v51 = vsel %vm60_vm0, %v386_v43, -inf  ;;  %v391_v54 = vsel %vm60_vm0, %v383_v41, -inf }
 0x104   :  { %v395_v48 = vmax.f32 %v389_v45, %v394_v47  ;;  %v393_v56 = vmax.f32 %v388_v52, %v392_v46  ;;  %v397_v57 = vmax.f32 %v390_v53, %v396_v51  ;;  %v289_v47 = vld [vmem:[#allocation6 + $0x1] sm:$0x1] }
 0x105   :  { %v398_v55 = vsel %vm60_vm0, %v387_v44, -inf  ;;  %vm446_vm4 = vcmp.gt.f32.partialorder %v289_v47, 0.0 }
 0x106   :  { %v399_v58 = vmax.f32 %v391_v54, %v398_v55  ;;  %v400_v59 = vmax.f32 %v393_v56, %v395_v48  ;;  %v447_v48 = vsel %vm446_vm4, 1, %v1757_v1  ;;  %v288_v54 = vld [vmem:[#allocation3 + $0x8] sm:$0xff] }
 0x107   :  { %v451_v52 = vrot.slane %v447_v48, %v1822_v2 }
 0x108   :  { %v401_v60 = vmax.f32 %v397_v57, %v399_v58 }
 0x109   :  { %vm452_vm5 = vcmp.eq.s32.totalorder %v451_v52, 1 }
 0x10a   :  { %v402_v63 = vmax.f32 %v400_v59, %v401_v60 }
 0x10c   :  { %v403_v0 = vsub.f32 %v380_v32, %v402_v63  ;;  %v404_v3 = vsub.f32 %v381_v35, %v402_v63  ;;  %v405_v4 = vsub.f32 %v382_v36, %v402_v63  ;;  %v406_v5 = vsub.f32 %v383_v41, %v402_v63 }
 0x10d   :  { %v407_v6 = vsub.f32 %v384_v37, %v402_v63  ;;  %v408_v11 = vsub.f32 %v385_v42, %v402_v63  ;;  %v409_v13 = vsub.f32 %v386_v43, %v402_v63  ;;  %v410_v16 = vsub.f32 %v387_v44, %v402_v63 }
 0x10e   :  { %v411_v7 = vmul.f32 1.442695, %v403_v0  ;;  %v413_v8 = vmul.f32 1.442695, %v404_v3  ;;  %v415_v9 = vmul.f32 1.442695, %v405_v4 }
 0x10f   :  { %v417_v12 = vmul.f32 1.442695, %v406_v5  ;;  %v419_v15 = vmul.f32 1.442695, %v407_v6  ;;  %v421_v17 = vmul.f32 1.442695, %v408_v11 }
 0x110   :  { %1526 = vpow2.f32 %v411_v7  ;;  %v423_v18 = vmul.f32 1.442695, %v409_v13  ;;  %v425_v14 = vmul.f32 1.442695, %v410_v16 }
 0x111   :  { %1528 = vpow2.f32 %v413_v8 }
 0x112   :  { %1530 = vpow2.f32 %v415_v9 }
 0x113   :  { %1532 = vpow2.f32 %v417_v12 }
 0x114   :  { %1534 = vpow2.f32 %v419_v15 }
 0x115   :  { %1536 = vpow2.f32 %v421_v17 }
 0x116   :  { %1538 = vpow2.f32 %v423_v18 }
 0x117   :  { %1540 = vpow2.f32 %v425_v14 }
 0x11a   :  { %v1527_v19 = vpop.eup %1526 }
 0x11b   :  { %v1529_v24 = vpop.eup %1528  ;;  %v427_v20 = vsel %vm60_vm0, %v1527_v19, 0.0 }
 0x11c   :  { %v1531_v21 = vpop.eup %1530  ;;  %v428_v22 = vsel %vm60_vm0, %v1529_v24, 0.0 }
 0x11d   :  { %v1533_v23 = vpop.eup %1532  ;;  %v429_v26 = vadd.f32 %v428_v22, %v427_v20  ;;  %v430_v27 = vsel %vm60_vm0, %v1531_v21, 0.0 }
 0x11e   :  { %v1535_v28 = vpop.eup %1534  ;;  %v432_v30 = vsel %vm60_vm0, %v1533_v23, 0.0 }
 0x11f   :  { %v431_v29 = vadd.f32 %v430_v27, %v429_v26  ;;  %v1537_v31 = vpop.eup %1536  ;;  %v434_v35 = vsel %vm60_vm0, %v1535_v28, 0.0 }
 0x120   :  { %v1539_v36 = vpop.eup %1538  ;;  %v436_v38 = vsel %vm60_vm0, %v1537_v31, 0.0 }
 0x121   :  { %v433_v32 = vadd.f32 %v432_v30, %v431_v29  ;;  %v1541_v41 = vpop.eup %1540  ;;  %v438_v43 = vsel %vm60_vm0, %v1539_v36, 0.0 }
 0x122   :  { %v440_v45 = vsel %vm60_vm0, %v1541_v41, 0.0 }
 0x123   :  { %v435_v37 = vadd.f32 %v434_v35, %v433_v32 }
 0x125   :  { %v437_v42 = vadd.f32 %v436_v38, %v435_v37 }
 0x127   :  { %v439_v44 = vadd.f32 %v438_v43, %v437_v42 }
 0x129   :  { %v441_v46 = vadd.f32 %v440_v45, %v439_v44 }
 0x12b   :  { %1542 = vlog2.f32 %v441_v46 }
 0x135   :  { %v1543_v51 = vpop.eup %1542 }
 0x136   :  { %v443_v53 = vmul.f32 0.6931472, %v1543_v51 }
 0x138   :  { %v444_v55 = vadd.f32 %v443_v53, %v402_v63 }
 0x13a   :  { %v445_v56 = vadd.f32 %v444_v55, %v288_v54 }
 0x13c   :  { %v1936_v57 = vsel %vm452_vm5, %v445_v56, %v1890_v10 }
 0x13d   :  { %v458_v58 = vcombine.high %v1936_v57, %v1936_v57  ;;  %v465_v59 = vrot.slane %v1936_v57, %v1828_v25 }
 0x13f   :  { %v472_v60 = vrot.slane %v458_v58, %v1828_v25  ;;  %v473_v0 = vcombine.high %v465_v59, %v465_v59  ;;  %v481_v3 = vrot.slane %v465_v59, %v1828_v25 }
 0x141   :  { %v474_v4 = vcombine.high %v472_v60, %v472_v60  ;;  %v488_v5 = vrot.slane %v472_v60, %v1828_v25  ;;  %v495_v63 = vrot.slane %v473_v0, %v1828_v25  ;;  %v503_v6 = vcombine.high %v481_v3, %v481_v3 }
 0x142   :  { %v510_v10 = vrot.slane %v481_v3, %v1822_v2 }
 0x143   :  { %v502_v7 = vrot.slane %v474_v4, %v1828_v25  ;;  %v504_v8 = vcombine.high %v488_v5, %v488_v5  ;;  %v505_v9 = vcombine.high %v495_v63, %v495_v63  ;;  %v514_v11 = vrot.slane %v495_v63, %v1822_v2 }
 0x144   :  { %v518_v12 = vrot.slane %v503_v6, %v1822_v2  ;;  %v526_v13 = vrot.slane %v488_v5, %v1822_v2  ;;  %v547_v14 = vadd.f32 %v510_v10, %v1839_v34 }
 0x145   :  { %v506_v15 = vcombine.high %v502_v7, %v502_v7  ;;  %v522_v16 = vrot.slane %v505_v9, %v1822_v2  ;;  %v530_v17 = vrot.slane %v502_v7, %v1822_v2  ;;  %v534_v18 = vrot.slane %v504_v8, %v1822_v2 }
 0x146   :  { %v548_v19 = vadd.f32 %v514_v11, %v1845_v40  ;;  %v549_v24 = vadd.f32 %v518_v12, %v1837_v33  ;;  %v551_v20 = vadd.f32 %v526_v13, %v1855_v50  ;;  %v555_v35 = vsel %vm60_vm0, %v547_v14, -inf }
 0x147   :  { %v538_v21 = vrot.slane %v506_v15, %v1822_v2  ;;  %v550_v22 = vadd.f32 %v522_v16, %v1843_v39  ;;  %v552_v23 = vadd.f32 %v530_v17, %v1853_v49  ;;  %v553_v26 = vadd.f32 %v534_v18, %v1869_v62 }
 0x148   :  { %v556_v28 = vsel %vm60_vm0, %v548_v19, -inf  ;;  %v559_v29 = vsel %vm60_vm0, %v551_v20, -inf  ;;  %v557_v36 = vsel %vm60_vm0, %v549_v24, -inf }
 0x149   :  { %v554_v27 = vadd.f32 %v538_v21, %v1867_v61  ;;  %v561_v30 = vsel %vm60_vm0, %v552_v23, -inf  ;;  %v563_v32 = vsel %vm60_vm0, %v553_v26, -inf  ;;  %v558_v37 = vsel %vm60_vm0, %v550_v22, -inf }
 0x14a   :  { %v562_v31 = vmax.f32 %v556_v28, %v561_v30  ;;  %v560_v41 = vmax.f32 %v555_v35, %v559_v29  ;;  %v564_v42 = vmax.f32 %v557_v36, %v563_v32  ;;  %v456_v30 = vld [vmem:[#allocation6 + $0x2] sm:$0x1] }
 0x14b   :  { %v565_v38 = vsel %vm60_vm0, %v554_v27, -inf  ;;  %vm613_vm6 = vcmp.gt.f32.partialorder %v456_v30, 0.0 }
 0x14c   :  { %v566_v43 = vmax.f32 %v558_v37, %v565_v38  ;;  %v567_v44 = vmax.f32 %v560_v41, %v562_v31  ;;  %v614_v31 = vsel %vm613_vm6, 1, %v1757_v1  ;;  %v455_v37 = vld [vmem:[#allocation3 + $0x10] sm:$0xff] }
 0x14d   :  { %v618_v35 = vrot.slane %v614_v31, %v1822_v2 }
 0x14e   :  { %v568_v45 = vmax.f32 %v564_v42, %v566_v43 }
 0x14f   :  { %vm619_vm7 = vcmp.eq.s32.totalorder %v618_v35, 1 }
 0x150   :  { %v569_v46 = vmax.f32 %v567_v44, %v568_v45 }
 0x152   :  { %v570_v47 = vsub.f32 %v547_v14, %v569_v46  ;;  %v571_v48 = vsub.f32 %v548_v19, %v569_v46  ;;  %v572_v51 = vsub.f32 %v549_v24, %v569_v46  ;;  %v573_v52 = vsub.f32 %v550_v22, %v569_v46 }
 0x153   :  { %v574_v53 = vsub.f32 %v551_v20, %v569_v46  ;;  %v575_v58 = vsub.f32 %v552_v23, %v569_v46  ;;  %v576_v60 = vsub.f32 %v553_v26, %v569_v46  ;;  %v577_v3 = vsub.f32 %v554_v27, %v569_v46 }
 0x154   :  { %v578_v54 = vmul.f32 1.442695, %v570_v47  ;;  %v580_v55 = vmul.f32 1.442695, %v571_v48  ;;  %v582_v56 = vmul.f32 1.442695, %v572_v51 }
 0x155   :  { %v584_v59 = vmul.f32 1.442695, %v573_v52  ;;  %v586_v0 = vmul.f32 1.442695, %v574_v53  ;;  %v588_v4 = vmul.f32 1.442695, %v575_v58 }
 0x156   :  { %1544 = vpow2.f32 %v578_v54  ;;  %v590_v5 = vmul.f32 1.442695, %v576_v60  ;;  %v592_v63 = vmul.f32 1.442695, %v577_v3 }
 0x157   :  { %1546 = vpow2.f32 %v580_v55 }
 0x158   :  { %1548 = vpow2.f32 %v582_v56 }
 0x159   :  { %1550 = vpow2.f32 %v584_v59 }
 0x15a   :  { %1552 = vpow2.f32 %v586_v0 }
 0x15b   :  { %1554 = vpow2.f32 %v588_v4 }
 0x15c   :  { %1556 = vpow2.f32 %v590_v5 }
 0x15d   :  { %1558 = vpow2.f32 %v592_v63 }
 0x160   :  { %v1545_v6 = vpop.eup %1544 }
 0x161   :  { %v1547_v10 = vpop.eup %1546  ;;  %v594_v7 = vsel %vm60_vm0, %v1545_v6, 0.0 }
 0x162   :  { %v1549_v8 = vpop.eup %1548  ;;  %v595_v9 = vsel %vm60_vm0, %v1547_v10, 0.0 }
 0x163   :  { %v1551_v11 = vpop.eup %1550  ;;  %v596_v12 = vadd.f32 %v595_v9, %v594_v7  ;;  %v597_v13 = vsel %vm60_vm0, %v1549_v8, 0.0 }
 0x164   :  { %v1553_v15 = vpop.eup %1552  ;;  %v599_v17 = vsel %vm60_vm0, %v1551_v11, 0.0 }
 0x165   :  { %v598_v16 = vadd.f32 %v597_v13, %v596_v12  ;;  %v1555_v18 = vpop.eup %1554  ;;  %v601_v19 = vsel %vm60_vm0, %v1553_v15, 0.0 }
 0x166   :  { %v1557_v24 = vpop.eup %1556  ;;  %v603_v21 = vsel %vm60_vm0, %v1555_v18, 0.0 }
 0x167   :  { %v600_v14 = vadd.f32 %v599_v17, %v598_v16  ;;  %v1559_v22 = vpop.eup %1558  ;;  %v605_v26 = vsel %vm60_vm0, %v1557_v24, 0.0 }
 0x168   :  { %v607_v28 = vsel %vm60_vm0, %v1559_v22, 0.0 }
 0x169   :  { %v602_v20 = vadd.f32 %v601_v19, %v600_v14 }
 0x16b   :  { %v604_v23 = vadd.f32 %v603_v21, %v602_v20 }
 0x16d   :  { %v606_v27 = vadd.f32 %v605_v26, %v604_v23 }
 0x16f   :  { %v608_v29 = vadd.f32 %v607_v28, %v606_v27 }
 0x171   :  { %1560 = vlog2.f32 %v608_v29 }
 0x17b   :  { %v1561_v32 = vpop.eup %1560 }
 0x17c   :  { %v610_v36 = vmul.f32 0.6931472, %v1561_v32 }
 0x17e   :  { %v611_v38 = vadd.f32 %v610_v36, %v569_v46 }
 0x180   :  { %v612_v41 = vadd.f32 %v611_v38, %v455_v37 }
 0x182   :  { %v1982_v42 = vsel %vm619_vm7, %v612_v41, %v1936_v57 }
 0x183   :  { %v625_v43 = vcombine.high %v1982_v42, %v1982_v42  ;;  %v632_v44 = vrot.slane %v1982_v42, %v1828_v25 }
 0x185   :  { %v639_v45 = vrot.slane %v625_v43, %v1828_v25  ;;  %v640_v47 = vcombine.high %v632_v44, %v632_v44  ;;  %v648_v48 = vrot.slane %v632_v44, %v1828_v25 }
 0x187   :  { %v641_v51 = vcombine.high %v639_v45, %v639_v45  ;;  %v655_v52 = vrot.slane %v639_v45, %v1828_v25  ;;  %v662_v46 = vrot.slane %v640_v47, %v1828_v25  ;;  %v670_v53 = vcombine.high %v648_v48, %v648_v48 }
 0x188   :  { %v677_v57 = vrot.slane %v648_v48, %v1822_v2 }
 0x189   :  { %v669_v54 = vrot.slane %v641_v51, %v1828_v25  ;;  %v671_v55 = vcombine.high %v655_v52, %v655_v52  ;;  %v672_v56 = vcombine.high %v662_v46, %v662_v46  ;;  %v681_v58 = vrot.slane %v662_v46, %v1822_v2 }
 0x18a   :  { %v685_v59 = vrot.slane %v670_v53, %v1822_v2  ;;  %v693_v60 = vrot.slane %v655_v52, %v1822_v2  ;;  %v714_v63 = vadd.f32 %v677_v57, %v1839_v34 }
 0x18b   :  { %v673_v0 = vcombine.high %v669_v54, %v669_v54  ;;  %v689_v3 = vrot.slane %v672_v56, %v1822_v2  ;;  %v697_v4 = vrot.slane %v669_v54, %v1822_v2  ;;  %v701_v5 = vrot.slane %v671_v55, %v1822_v2 }
 0x18c   :  { %v715_v6 = vadd.f32 %v681_v58, %v1845_v40  ;;  %v716_v10 = vadd.f32 %v685_v59, %v1837_v33  ;;  %v718_v7 = vadd.f32 %v693_v60, %v1855_v50  ;;  %v722_v19 = vsel %vm60_vm0, %v714_v63, -inf }
 0x18d   :  { %v705_v8 = vrot.slane %v673_v0, %v1822_v2  ;;  %v717_v9 = vadd.f32 %v689_v3, %v1843_v39  ;;  %v719_v11 = vadd.f32 %v697_v4, %v1853_v49  ;;  %v720_v12 = vadd.f32 %v701_v5, %v1869_v62 }
 0x18e   :  { %v723_v15 = vsel %vm60_vm0, %v715_v6, -inf  ;;  %v726_v16 = vsel %vm60_vm0, %v718_v7, -inf  ;;  %v724_v24 = vsel %vm60_vm0, %v716_v10, -inf }
 0x18f   :  { %v721_v13 = vadd.f32 %v705_v8, %v1867_v61  ;;  %v728_v17 = vsel %vm60_vm0, %v719_v11, -inf  ;;  %v730_v14 = vsel %vm60_vm0, %v720_v12, -inf  ;;  %v725_v20 = vsel %vm60_vm0, %v717_v9, -inf }
 0x190   :  { %v729_v18 = vmax.f32 %v723_v15, %v728_v17  ;;  %v727_v22 = vmax.f32 %v722_v19, %v726_v16  ;;  %v731_v23 = vmax.f32 %v724_v24, %v730_v14  ;;  %v623_v17 = vld [vmem:[#allocation6 + $0x3] sm:$0x1] }
 0x191   :  { %v732_v21 = vsel %vm60_vm0, %v721_v13, -inf  ;;  %vm780_vm8 = vcmp.gt.f32.partialorder %v623_v17, 0.0 }
 0x192   :  { %v733_v26 = vmax.f32 %v725_v20, %v732_v21  ;;  %v734_v27 = vmax.f32 %v727_v22, %v729_v18  ;;  %v781_v18 = vsel %vm780_vm8, 1, %v1757_v1  ;;  %v622_v20 = vld [vmem:[#allocation3 + $0x18] sm:$0xff] }
 0x193   :  { %v785_v19 = vrot.slane %v781_v18, %v1822_v2 }
 0x194   :  { %v735_v28 = vmax.f32 %v731_v23, %v733_v26 }
 0x195   :  { %vm786_vm9 = vcmp.eq.s32.totalorder %v785_v19, 1 }
 0x196   :  { %v736_v29 = vmax.f32 %v734_v27, %v735_v28 }
 0x198   :  { %v737_v30 = vsub.f32 %v714_v63, %v736_v29  ;;  %v738_v31 = vsub.f32 %v715_v6, %v736_v29  ;;  %v739_v32 = vsub.f32 %v716_v10, %v736_v29  ;;  %v740_v35 = vsub.f32 %v717_v9, %v736_v29 }
 0x199   :  { %v741_v36 = vsub.f32 %v718_v7, %v736_v29  ;;  %v742_v43 = vsub.f32 %v719_v11, %v736_v29  ;;  %v743_v45 = vsub.f32 %v720_v12, %v736_v29  ;;  %v744_v48 = vsub.f32 %v721_v13, %v736_v29 }
 0x19a   :  { %v745_v37 = vmul.f32 1.442695, %v737_v30  ;;  %v747_v38 = vmul.f32 1.442695, %v738_v31  ;;  %v749_v41 = vmul.f32 1.442695, %v739_v32 }
 0x19b   :  { %v751_v44 = vmul.f32 1.442695, %v740_v35  ;;  %v753_v47 = vmul.f32 1.442695, %v741_v36  ;;  %v755_v51 = vmul.f32 1.442695, %v742_v43 }
 0x19c   :  { %1562 = vpow2.f32 %v745_v37  ;;  %v757_v52 = vmul.f32 1.442695, %v743_v45  ;;  %v759_v46 = vmul.f32 1.442695, %v744_v48 }
 0x19d   :  { %1564 = vpow2.f32 %v747_v38 }
 0x19e   :  { %1566 = vpow2.f32 %v749_v41 }
 0x19f   :  { %1568 = vpow2.f32 %v751_v44 }
 0x1a0   :  { %1570 = vpow2.f32 %v753_v47 }
 0x1a1   :  { %1572 = vpow2.f32 %v755_v51 }
 0x1a2   :  { %1574 = vpow2.f32 %v757_v52 }
 0x1a3   :  { %1576 = vpow2.f32 %v759_v46 }
 0x1a6   :  { %v1563_v53 = vpop.eup %1562 }
 0x1a7   :  { %v1565_v57 = vpop.eup %1564  ;;  %v761_v54 = vsel %vm60_vm0, %v1563_v53, 0.0 }
 0x1a8   :  { %v1567_v55 = vpop.eup %1566  ;;  %v762_v56 = vsel %vm60_vm0, %v1565_v57, 0.0 }
 0x1a9   :  { %v1569_v58 = vpop.eup %1568  ;;  %v763_v59 = vadd.f32 %v762_v56, %v761_v54  ;;  %v764_v60 = vsel %vm60_vm0, %v1567_v55, 0.0 }
 0x1aa   :  { %v1571_v0 = vpop.eup %1570  ;;  %v766_v4 = vsel %vm60_vm0, %v1569_v58, 0.0 }
 0x1ab   :  { %v765_v3 = vadd.f32 %v764_v60, %v763_v59  ;;  %v1573_v5 = vpop.eup %1572  ;;  %v768_v6 = vsel %vm60_vm0, %v1571_v0, 0.0 }
 0x1ac   :  { %v1575_v10 = vpop.eup %1574  ;;  %v770_v8 = vsel %vm60_vm0, %v1573_v5, 0.0 }
 0x1ad   :  { %v767_v63 = vadd.f32 %v766_v4, %v765_v3  ;;  %v1577_v9 = vpop.eup %1576  ;;  %v772_v12 = vsel %vm60_vm0, %v1575_v10, 0.0 }
 0x1ae   :  { %v774_v15 = vsel %vm60_vm0, %v1577_v9, 0.0 }
 0x1af   :  { %v769_v7 = vadd.f32 %v768_v6, %v767_v63 }
 0x1b1   :  { %v771_v11 = vadd.f32 %v770_v8, %v769_v7 }
 0x1b3   :  { %v773_v13 = vadd.f32 %v772_v12, %v771_v11 }
 0x1b5   :  { %v775_v16 = vadd.f32 %v774_v15, %v773_v13 }
 0x1b7   :  { %1578 = vlog2.f32 %v775_v16 }
 0x1c1   :  { %v1579_v14 = vpop.eup %1578 }
 0x1c2   :  { %v777_v24 = vmul.f32 0.6931472, %v1579_v14 }
 0x1c4   :  { %v778_v21 = vadd.f32 %v777_v24, %v736_v29 }
 0x1c6   :  { %v779_v22 = vadd.f32 %v778_v21, %v622_v20 }
 0x1c8   :  { %v2028_v23 = vsel %vm786_vm9, %v779_v22, %v1982_v42 }
 0x1c9   :  { %v792_v26 = vcombine.high %v2028_v23, %v2028_v23  ;;  %v799_v27 = vrot.slane %v2028_v23, %v1828_v25 }
 0x1cb   :  { %v806_v28 = vrot.slane %v792_v26, %v1828_v25  ;;  %v807_v30 = vcombine.high %v799_v27, %v799_v27  ;;  %v815_v31 = vrot.slane %v799_v27, %v1828_v25 }
 0x1cd   :  { %v808_v32 = vcombine.high %v806_v28, %v806_v28  ;;  %v822_v35 = vrot.slane %v806_v28, %v1828_v25  ;;  %v829_v29 = vrot.slane %v807_v30, %v1828_v25  ;;  %v837_v36 = vcombine.high %v815_v31, %v815_v31 }
 0x1ce   :  { %v844_v42 = vrot.slane %v815_v31, %v1822_v2 }
 0x1cf   :  { %v836_v37 = vrot.slane %v808_v32, %v1828_v25  ;;  %v838_v38 = vcombine.high %v822_v35, %v822_v35  ;;  %v839_v41 = vcombine.high %v829_v29, %v829_v29  ;;  %v848_v43 = vrot.slane %v829_v29, %v1822_v2 }
 0x1d0   :  { %v852_v44 = vrot.slane %v837_v36, %v1822_v2  ;;  %v860_v45 = vrot.slane %v822_v35, %v1822_v2  ;;  %v881_v46 = vadd.f32 %v844_v42, %v1839_v34 }
 0x1d1   :  { %v840_v47 = vcombine.high %v836_v37, %v836_v37  ;;  %v856_v48 = vrot.slane %v839_v41, %v1822_v2  ;;  %v864_v51 = vrot.slane %v836_v37, %v1822_v2  ;;  %v868_v52 = vrot.slane %v838_v38, %v1822_v2 }
 0x1d2   :  { %v882_v53 = vadd.f32 %v848_v43, %v1845_v40  ;;  %v883_v57 = vadd.f32 %v852_v44, %v1837_v33  ;;  %v885_v54 = vadd.f32 %v860_v45, %v1855_v50  ;;  %v889_v6 = vsel %vm60_vm0, %v881_v46, -inf }
 0x1d3   :  { %v872_v55 = vrot.slane %v840_v47, %v1822_v2  ;;  %v884_v56 = vadd.f32 %v856_v48, %v1843_v39  ;;  %v886_v58 = vadd.f32 %v864_v51, %v1853_v49  ;;  %v887_v59 = vadd.f32 %v868_v52, %v1869_v62 }
 0x1d4   :  { %v890_v0 = vsel %vm60_vm0, %v882_v53, -inf  ;;  %v893_v3 = vsel %vm60_vm0, %v885_v54, -inf  ;;  %v891_v10 = vsel %vm60_vm0, %v883_v57, -inf }
 0x1d5   :  { %v888_v60 = vadd.f32 %v872_v55, %v1867_v61  ;;  %v895_v4 = vsel %vm60_vm0, %v886_v58, -inf  ;;  %v897_v63 = vsel %vm60_vm0, %v887_v59, -inf  ;;  %v892_v7 = vsel %vm60_vm0, %v884_v56, -inf }
 0x1d6   :  { %v896_v5 = vmax.f32 %v890_v0, %v895_v4  ;;  %v894_v9 = vmax.f32 %v889_v6, %v893_v3  ;;  %v898_v11 = vmax.f32 %v891_v10, %v897_v63  ;;  %v790_v4 = vld [vmem:[#allocation6 + $0x4] sm:$0x1] }
 0x1d7   :  { %v899_v8 = vsel %vm60_vm0, %v888_v60, -inf  ;;  %vm947_vm10 = vcmp.gt.f32.partialorder %v790_v4, 0.0 }
 0x1d8   :  { %v900_v12 = vmax.f32 %v892_v7, %v899_v8  ;;  %v901_v13 = vmax.f32 %v894_v9, %v896_v5  ;;  %v948_v5 = vsel %vm947_vm10, 1, %v1757_v1  ;;  %v789_v7 = vld [vmem:[#allocation3 + $0x20] sm:$0xff] }
 0x1d9   :  { %v952_v6 = vrot.slane %v948_v5, %v1822_v2 }
 0x1da   :  { %v902_v15 = vmax.f32 %v898_v11, %v900_v12 }
 0x1db   :  { %vm953_vm11 = vcmp.eq.s32.totalorder %v952_v6, 1 }
 0x1dc   :  { %v903_v16 = vmax.f32 %v901_v13, %v902_v15 }
 0x1de   :  { %v904_v17 = vsub.f32 %v881_v46, %v903_v16  ;;  %v905_v18 = vsub.f32 %v882_v53, %v903_v16  ;;  %v906_v14 = vsub.f32 %v883_v57, %v903_v16  ;;  %v907_v19 = vsub.f32 %v884_v56, %v903_v16 }
 0x1df   :  { %v908_v24 = vsub.f32 %v885_v54, %v903_v16  ;;  %v909_v26 = vsub.f32 %v886_v58, %v903_v16  ;;  %v910_v28 = vsub.f32 %v887_v59, %v903_v16  ;;  %v911_v31 = vsub.f32 %v888_v60, %v903_v16 }
 0x1e0   :  { %v912_v20 = vmul.f32 1.442695, %v904_v17  ;;  %v914_v21 = vmul.f32 1.442695, %v905_v18  ;;  %v916_v22 = vmul.f32 1.442695, %v906_v14 }
 0x1e1   :  { %v918_v27 = vmul.f32 1.442695, %v907_v19  ;;  %v920_v30 = vmul.f32 1.442695, %v908_v24  ;;  %v922_v32 = vmul.f32 1.442695, %v909_v26 }
 0x1e2   :  { %1580 = vpow2.f32 %v912_v20  ;;  %v924_v35 = vmul.f32 1.442695, %v910_v28  ;;  %v926_v29 = vmul.f32 1.442695, %v911_v31 }
 0x1e3   :  { %1582 = vpow2.f32 %v914_v21 }
 0x1e4   :  { %1584 = vpow2.f32 %v916_v22 }
 0x1e5   :  { %1586 = vpow2.f32 %v918_v27 }
 0x1e6   :  { %1588 = vpow2.f32 %v920_v30 }
 0x1e7   :  { %1590 = vpow2.f32 %v922_v32 }
 0x1e8   :  { %1592 = vpow2.f32 %v924_v35 }
 0x1e9   :  { %1594 = vpow2.f32 %v926_v29 }
 0x1ec   :  { %v1581_v36 = vpop.eup %1580 }
 0x1ed   :  { %v1583_v42 = vpop.eup %1582  ;;  %v928_v37 = vsel %vm60_vm0, %v1581_v36, 0.0 }
 0x1ee   :  { %v1585_v38 = vpop.eup %1584  ;;  %v929_v41 = vsel %vm60_vm0, %v1583_v42, 0.0 }
 0x1ef   :  { %v1587_v43 = vpop.eup %1586  ;;  %v930_v44 = vadd.f32 %v929_v41, %v928_v37  ;;  %v931_v45 = vsel %vm60_vm0, %v1585_v38, 0.0 }
 0x1f0   :  { %v1589_v47 = vpop.eup %1588  ;;  %v933_v51 = vsel %vm60_vm0, %v1587_v43, 0.0 }
 0x1f1   :  { %v932_v48 = vadd.f32 %v931_v45, %v930_v44  ;;  %v1591_v52 = vpop.eup %1590  ;;  %v935_v53 = vsel %vm60_vm0, %v1589_v47, 0.0 }
 0x1f2   :  { %v1593_v57 = vpop.eup %1592  ;;  %v937_v55 = vsel %vm60_vm0, %v1591_v52, 0.0 }
 0x1f3   :  { %v934_v46 = vadd.f32 %v933_v51, %v932_v48  ;;  %v1595_v56 = vpop.eup %1594  ;;  %v939_v59 = vsel %vm60_vm0, %v1593_v57, 0.0 }
 0x1f4   :  { %v941_v0 = vsel %vm60_vm0, %v1595_v56, 0.0 }
 0x1f5   :  { %v936_v54 = vadd.f32 %v935_v53, %v934_v46 }
 0x1f7   :  { %v938_v58 = vadd.f32 %v937_v55, %v936_v54 }
 0x1f9   :  { %v940_v60 = vadd.f32 %v939_v59, %v938_v58 }
 0x1fb   :  { %v942_v3 = vadd.f32 %v941_v0, %v940_v60 }
 0x1fd   :  { %1596 = vlog2.f32 %v942_v3 }
 0x207   :  { %v1597_v63 = vpop.eup %1596 }
 0x208   :  { %v944_v10 = vmul.f32 0.6931472, %v1597_v63 }
 0x20a   :  { %v945_v8 = vadd.f32 %v944_v10, %v903_v16 }
 0x20c   :  { %v946_v9 = vadd.f32 %v945_v8, %v789_v7 }
 0x20e   :  { %v2074_v11 = vsel %vm953_vm11, %v946_v9, %v2028_v23 }
 0x20f   :  { %v959_v12 = vcombine.high %v2074_v11, %v2074_v11  ;;  %v966_v13 = vrot.slane %v2074_v11, %v1828_v25 }
 0x211   :  { %v973_v15 = vrot.slane %v959_v12, %v1828_v25  ;;  %v974_v17 = vcombine.high %v966_v13, %v966_v13  ;;  %v982_v18 = vrot.slane %v966_v13, %v1828_v25 }
 0x213   :  { %v975_v14 = vcombine.high %v973_v15, %v973_v15  ;;  %v989_v19 = vrot.slane %v973_v15, %v1828_v25  ;;  %v996_v16 = vrot.slane %v974_v17, %v1828_v25  ;;  %v1004_v24 = vcombine.high %v982_v18, %v982_v18 }
 0x214   :  { %v1011_v23 = vrot.slane %v982_v18, %v1822_v2 }
 0x215   :  { %v1003_v20 = vrot.slane %v975_v14, %v1828_v25  ;;  %v1005_v21 = vcombine.high %v989_v19, %v989_v19  ;;  %v1006_v22 = vcombine.high %v996_v16, %v996_v16  ;;  %v1015_v26 = vrot.slane %v996_v16, %v1822_v2 }
 0x216   :  { %v1019_v27 = vrot.slane %v1004_v24, %v1822_v2  ;;  %v1027_v28 = vrot.slane %v989_v19, %v1822_v2  ;;  %v1048_v29 = vadd.f32 %v1011_v23, %v1839_v34 }
 0x217   :  { %v1007_v30 = vcombine.high %v1003_v20, %v1003_v20  ;;  %v1023_v31 = vrot.slane %v1006_v22, %v1822_v2  ;;  %v1031_v32 = vrot.slane %v1003_v20, %v1822_v2  ;;  %v1035_v35 = vrot.slane %v1005_v21, %v1822_v2 }
 0x218   :  { %v1049_v36 = vadd.f32 %v1015_v26, %v1845_v40  ;;  %v1050_v42 = vadd.f32 %v1019_v27, %v1837_v33  ;;  %v1052_v37 = vadd.f32 %v1027_v28, %v1855_v50  ;;  %v1056_v53 = vsel %vm60_vm0, %v1048_v29, -inf }
 0x219   :  { %v1039_v38 = vrot.slane %v1007_v30, %v1822_v2  ;;  %v1051_v41 = vadd.f32 %v1023_v31, %v1843_v39  ;;  %v1053_v43 = vadd.f32 %v1031_v32, %v1853_v49  ;;  %v1054_v44 = vadd.f32 %v1035_v35, %v1869_v62 }
 0x21a   :  { %v1057_v47 = vsel %vm60_vm0, %v1049_v36, -inf  ;;  %v1060_v48 = vsel %vm60_vm0, %v1052_v37, -inf  ;;  %v1058_v57 = vsel %vm60_vm0, %v1050_v42, -inf }
 0x21b   :  { %v1055_v45 = vadd.f32 %v1039_v38, %v1867_v61  ;;  %v1062_v51 = vsel %vm60_vm0, %v1053_v43, -inf  ;;  %v1064_v46 = vsel %vm60_vm0, %v1054_v44, -inf  ;;  %v1059_v54 = vsel %vm60_vm0, %v1051_v41, -inf }
 0x21c   :  { %v1063_v52 = vmax.f32 %v1057_v47, %v1062_v51  ;;  %v1061_v56 = vmax.f32 %v1056_v53, %v1060_v48  ;;  %v1065_v58 = vmax.f32 %v1058_v57, %v1064_v46  ;;  %v957_v51 = vld [vmem:[#allocation6 + $0x5] sm:$0x1] }
 0x21d   :  { %v1066_v55 = vsel %vm60_vm0, %v1055_v45, -inf  ;;  %vm1114_vm12 = vcmp.gt.f32.partialorder %v957_v51, 0.0 }
 0x21e   :  { %v1067_v59 = vmax.f32 %v1059_v54, %v1066_v55  ;;  %v1068_v60 = vmax.f32 %v1061_v56, %v1063_v52  ;;  %v1115_v52 = vsel %vm1114_vm12, 1, %v1757_v1  ;;  %v956_v54 = vld [vmem:[#allocation3 + $0x28] sm:$0xff] }
 0x21f   :  { %v1119_v53 = vrot.slane %v1115_v52, %v1822_v2 }
 0x220   :  { %v1069_v0 = vmax.f32 %v1065_v58, %v1067_v59 }
 0x221   :  { %vm1120_vm13 = vcmp.eq.s32.totalorder %v1119_v53, 1 }
 0x222   :  { %v1070_v3 = vmax.f32 %v1068_v60, %v1069_v0 }
 0x224   :  { %v1071_v4 = vsub.f32 %v1048_v29, %v1070_v3  ;;  %v1072_v5 = vsub.f32 %v1049_v36, %v1070_v3  ;;  %v1073_v63 = vsub.f32 %v1050_v42, %v1070_v3  ;;  %v1074_v6 = vsub.f32 %v1051_v41, %v1070_v3 }
 0x225   :  { %v1075_v10 = vsub.f32 %v1052_v37, %v1070_v3  ;;  %v1076_v12 = vsub.f32 %v1053_v43, %v1070_v3  ;;  %v1077_v15 = vsub.f32 %v1054_v44, %v1070_v3  ;;  %v1078_v18 = vsub.f32 %v1055_v45, %v1070_v3 }
 0x226   :  { %v1079_v7 = vmul.f32 1.442695, %v1071_v4  ;;  %v1081_v8 = vmul.f32 1.442695, %v1072_v5  ;;  %v1083_v9 = vmul.f32 1.442695, %v1073_v63 }
 0x227   :  { %v1085_v13 = vmul.f32 1.442695, %v1074_v6  ;;  %v1087_v17 = vmul.f32 1.442695, %v1075_v10  ;;  %v1089_v14 = vmul.f32 1.442695, %v1076_v12 }
 0x228   :  { %1598 = vpow2.f32 %v1079_v7  ;;  %v1091_v19 = vmul.f32 1.442695, %v1077_v15  ;;  %v1093_v16 = vmul.f32 1.442695, %v1078_v18 }
 0x229   :  { %1600 = vpow2.f32 %v1081_v8 }
 0x22a   :  { %1602 = vpow2.f32 %v1083_v9 }
 0x22b   :  { %1604 = vpow2.f32 %v1085_v13 }
 0x22c   :  { %1606 = vpow2.f32 %v1087_v17 }
 0x22d   :  { %1608 = vpow2.f32 %v1089_v14 }
 0x22e   :  { %1610 = vpow2.f32 %v1091_v19 }
 0x22f   :  { %1612 = vpow2.f32 %v1093_v16 }
 0x232   :  { %v1599_v24 = vpop.eup %1598 }
 0x233   :  { %v1601_v23 = vpop.eup %1600  ;;  %v1095_v20 = vsel %vm60_vm0, %v1599_v24, 0.0 }
 0x234   :  { %v1603_v21 = vpop.eup %1602  ;;  %v1096_v22 = vsel %vm60_vm0, %v1601_v23, 0.0 }
 0x235   :  { %v1605_v26 = vpop.eup %1604  ;;  %v1097_v27 = vadd.f32 %v1096_v22, %v1095_v20  ;;  %v1098_v28 = vsel %vm60_vm0, %v1603_v21, 0.0 }
 0x236   :  { %v1607_v30 = vpop.eup %1606  ;;  %v1100_v32 = vsel %vm60_vm0, %v1605_v26, 0.0 }
 0x237   :  { %v1099_v31 = vadd.f32 %v1098_v28, %v1097_v27  ;;  %v1609_v35 = vpop.eup %1608  ;;  %v1102_v36 = vsel %vm60_vm0, %v1607_v30, 0.0 }
 0x238   :  { %v1611_v42 = vpop.eup %1610  ;;  %v1104_v38 = vsel %vm60_vm0, %v1609_v35, 0.0 }
 0x239   :  { %v1101_v29 = vadd.f32 %v1100_v32, %v1099_v31  ;;  %v1613_v41 = vpop.eup %1612  ;;  %v1106_v44 = vsel %vm60_vm0, %v1611_v42, 0.0 }
 0x23a   :  { %v1108_v47 = vsel %vm60_vm0, %v1613_v41, 0.0 }
 0x23b   :  { %v1103_v37 = vadd.f32 %v1102_v36, %v1101_v29 }
 0x23d   :  { %v1105_v43 = vadd.f32 %v1104_v38, %v1103_v37 }
 0x23f   :  { %v1107_v45 = vadd.f32 %v1106_v44, %v1105_v43 }
 0x241   :  { %v1109_v48 = vadd.f32 %v1108_v47, %v1107_v45 }
 0x243   :  { %1614 = vlog2.f32 %v1109_v48 }
 0x24d   :  { %v1615_v46 = vpop.eup %1614 }
 0x24e   :  { %v1111_v57 = vmul.f32 0.6931472, %v1615_v46 }
 0x250   :  { %v1112_v55 = vadd.f32 %v1111_v57, %v1070_v3 }
 0x252   :  { %v1113_v56 = vadd.f32 %v1112_v55, %v956_v54 }
 0x254   :  { %v2120_v58 = vsel %vm1120_vm13, %v1113_v56, %v2074_v11 }
 0x255   :  { %v1126_v59 = vcombine.high %v2120_v58, %v2120_v58  ;;  %v1133_v60 = vrot.slane %v2120_v58, %v1828_v25 }
 0x257   :  { %v1140_v0 = vrot.slane %v1126_v59, %v1828_v25  ;;  %v1141_v4 = vcombine.high %v1133_v60, %v1133_v60  ;;  %v1149_v5 = vrot.slane %v1133_v60, %v1828_v25 }
 0x259   :  { %v1142_v63 = vcombine.high %v1140_v0, %v1140_v0  ;;  %v1156_v6 = vrot.slane %v1140_v0, %v1828_v25  ;;  %v1163_v3 = vrot.slane %v1141_v4, %v1828_v25  ;;  %v1171_v10 = vcombine.high %v1149_v5, %v1149_v5 }
 0x25a   :  { %v1178_v11 = vrot.slane %v1149_v5, %v1822_v2 }
 0x25b   :  { %v1170_v7 = vrot.slane %v1142_v63, %v1828_v25  ;;  %v1172_v8 = vcombine.high %v1156_v6, %v1156_v6  ;;  %v1173_v9 = vcombine.high %v1163_v3, %v1163_v3  ;;  %v1182_v12 = vrot.slane %v1163_v3, %v1822_v2 }
 0x25c   :  { %v1186_v13 = vrot.slane %v1171_v10, %v1822_v2  ;;  %v1194_v15 = vrot.slane %v1156_v6, %v1822_v2  ;;  %v1215_v16 = vadd.f32 %v1178_v11, %v1839_v34 }
 0x25d   :  { %v1174_v17 = vcombine.high %v1170_v7, %v1170_v7  ;;  %v1190_v18 = vrot.slane %v1173_v9, %v1822_v2  ;;  %v1198_v14 = vrot.slane %v1170_v7, %v1822_v2  ;;  %v1202_v19 = vrot.slane %v1172_v8, %v1822_v2 }
 0x25e   :  { %v1216_v24 = vadd.f32 %v1182_v12, %v1845_v40  ;;  %v1217_v23 = vadd.f32 %v1186_v13, %v1837_v33  ;;  %v1219_v20 = vadd.f32 %v1194_v15, %v1855_v50  ;;  %v1223_v36 = vsel %vm60_vm0, %v1215_v16, -inf }
 0x25f   :  { %v1206_v21 = vrot.slane %v1174_v17, %v1822_v2  ;;  %v1218_v22 = vadd.f32 %v1190_v18, %v1843_v39  ;;  %v1220_v26 = vadd.f32 %v1198_v14, %v1853_v49  ;;  %v1221_v27 = vadd.f32 %v1202_v19, %v1869_v62 }
 0x260   :  { %v1224_v30 = vsel %vm60_vm0, %v1216_v24, -inf  ;;  %v1227_v31 = vsel %vm60_vm0, %v1219_v20, -inf  ;;  %v1225_v42 = vsel %vm60_vm0, %v1217_v23, -inf }
 0x261   :  { %v1222_v28 = vadd.f32 %v1206_v21, %v1867_v61  ;;  %v1229_v32 = vsel %vm60_vm0, %v1220_v26, -inf  ;;  %v1231_v29 = vsel %vm60_vm0, %v1221_v27, -inf  ;;  %v1226_v37 = vsel %vm60_vm0, %v1218_v22, -inf }
 0x262   :  { %v1230_v35 = vmax.f32 %v1224_v30, %v1229_v32  ;;  %v1228_v41 = vmax.f32 %v1223_v36, %v1227_v31  ;;  %v1232_v43 = vmax.f32 %v1225_v42, %v1231_v29  ;;  %v1124_v32 = vld [vmem:[#allocation6 + $0x6] sm:$0x1] }
 0x263   :  { %v1233_v38 = vsel %vm60_vm0, %v1222_v28, -inf  ;;  %vm1281_vm14 = vcmp.gt.f32.partialorder %v1124_v32, 0.0 }
 0x264   :  { %v1234_v44 = vmax.f32 %v1226_v37, %v1233_v38  ;;  %v1235_v45 = vmax.f32 %v1228_v41, %v1230_v35  ;;  %v1282_v35 = vsel %vm1281_vm14, 1, %v1757_v1  ;;  %v1123_v37 = vld [vmem:[#allocation3 + $0x30] sm:$0xff] }
 0x265   :  { %v1286_v36 = vrot.slane %v1282_v35, %v1822_v2 }
 0x266   :  { %v1236_v47 = vmax.f32 %v1232_v43, %v1234_v44 }
 0x267   :  { %vm1287_vm15 = vcmp.eq.s32.totalorder %v1286_v36, 1 }
 0x268   :  { %v1237_v48 = vmax.f32 %v1235_v45, %v1236_v47 }
 0x26a   :  { %v1238_v51 = vsub.f32 %v1215_v16, %v1237_v48  ;;  %v1239_v52 = vsub.f32 %v1216_v24, %v1237_v48  ;;  %v1240_v46 = vsub.f32 %v1217_v23, %v1237_v48  ;;  %v1241_v53 = vsub.f32 %v1218_v22, %v1237_v48 }
 0x26b   :  { %v1242_v57 = vsub.f32 %v1219_v20, %v1237_v48  ;;  %v1243_v59 = vsub.f32 %v1220_v26, %v1237_v48  ;;  %v1244_v0 = vsub.f32 %v1221_v27, %v1237_v48  ;;  %v1245_v5 = vsub.f32 %v1222_v28, %v1237_v48 }
 0x26c   :  { %v1246_v54 = vmul.f32 1.442695, %v1238_v51  ;;  %v1248_v55 = vmul.f32 1.442695, %v1239_v52  ;;  %v1250_v56 = vmul.f32 1.442695, %v1240_v46 }
 0x26d   :  { %v1252_v60 = vmul.f32 1.442695, %v1241_v53  ;;  %v1254_v4 = vmul.f32 1.442695, %v1242_v57  ;;  %v1256_v63 = vmul.f32 1.442695, %v1243_v59 }
 0x26e   :  { %1616 = vpow2.f32 %v1246_v54  ;;  %v1258_v6 = vmul.f32 1.442695, %v1244_v0  ;;  %v1260_v3 = vmul.f32 1.442695, %v1245_v5 }
 0x26f   :  { %1618 = vpow2.f32 %v1248_v55 }
 0x270   :  { %1620 = vpow2.f32 %v1250_v56 }
 0x271   :  { %1622 = vpow2.f32 %v1252_v60 }
 0x272   :  { %1624 = vpow2.f32 %v1254_v4 }
 0x273   :  { %1626 = vpow2.f32 %v1256_v63 }
 0x274   :  { %1628 = vpow2.f32 %v1258_v6 }
 0x275   :  { %1630 = vpow2.f32 %v1260_v3 }
 0x278   :  { %v1617_v10 = vpop.eup %1616 }
 0x279   :  { %v1619_v11 = vpop.eup %1618  ;;  %v1262_v7 = vsel %vm60_vm0, %v1617_v10, 0.0 }
 0x27a   :  { %v1621_v8 = vpop.eup %1620  ;;  %v1263_v9 = vsel %vm60_vm0, %v1619_v11, 0.0 }
 0x27b   :  { %v1623_v12 = vpop.eup %1622  ;;  %v1264_v13 = vadd.f32 %v1263_v9, %v1262_v7  ;;  %v1265_v15 = vsel %vm60_vm0, %v1621_v8, 0.0 }
 0x27c   :  { %v1625_v17 = vpop.eup %1624  ;;  %v1267_v14 = vsel %vm60_vm0, %v1623_v12, 0.0 }
 0x27d   :  { %v1266_v18 = vadd.f32 %v1265_v15, %v1264_v13  ;;  %v1627_v19 = vpop.eup %1626  ;;  %v1269_v24 = vsel %vm60_vm0, %v1625_v17, 0.0 }
 0x27e   :  { %v1629_v23 = vpop.eup %1628  ;;  %v1271_v21 = vsel %vm60_vm0, %v1627_v19, 0.0 }
 0x27f   :  { %v1268_v16 = vadd.f32 %v1267_v14, %v1266_v18  ;;  %v1631_v22 = vpop.eup %1630  ;;  %v1273_v27 = vsel %vm60_vm0, %v1629_v23, 0.0 }
 0x280   :  { %v1275_v30 = vsel %vm60_vm0, %v1631_v22, 0.0 }
 0x281   :  { %v1270_v20 = vadd.f32 %v1269_v24, %v1268_v16 }
 0x283   :  { %v1272_v26 = vadd.f32 %v1271_v21, %v1270_v20 }
 0x285   :  { %v1274_v28 = vadd.f32 %v1273_v27, %v1272_v26 }
 0x287   :  { %v1276_v31 = vadd.f32 %v1275_v30, %v1274_v28 }
 0x289   :  { %1632 = vlog2.f32 %v1276_v31 }
 0x293   :  { %v1633_v29 = vpop.eup %1632 }
 0x294   :  { %v1278_v42 = vmul.f32 0.6931472, %v1633_v29 }
 0x296   :  { %v1279_v38 = vadd.f32 %v1278_v42, %v1237_v48 }
 0x298   :  { %v1280_v41 = vadd.f32 %v1279_v38, %v1123_v37 }
 0x29a   :  { %v2166_v43 = vsel %vm1287_vm15, %v1280_v41, %v2120_v58 }
 0x29b   :  { %v1293_v44 = vcombine.high %v2166_v43, %v2166_v43  ;;  %v1300_v45 = vrot.slane %v2166_v43, %v1828_v25 }
 0x29d   :  { %v1307_v47 = vrot.slane %v1293_v44, %v1828_v25  ;;  %v1308_v51 = vcombine.high %v1300_v45, %v1300_v45  ;;  %v1316_v52 = vrot.slane %v1300_v45, %v1828_v25 }
 0x29f   :  { %v1309_v46 = vcombine.high %v1307_v47, %v1307_v47  ;;  %v1323_v53 = vrot.slane %v1307_v47, %v1828_v25  ;;  %v1330_v48 = vrot.slane %v1308_v51, %v1828_v25  ;;  %v1338_v57 = vcombine.high %v1316_v52, %v1316_v52 }
 0x2a0   :  { %v1345_v58 = vrot.slane %v1316_v52, %v1822_v2 }
 0x2a1   :  { %v1337_v54 = vrot.slane %v1309_v46, %v1828_v25  ;;  %v1339_v55 = vcombine.high %v1323_v53, %v1323_v53  ;;  %v1340_v56 = vcombine.high %v1330_v48, %v1330_v48  ;;  %v1349_v59 = vrot.slane %v1330_v48, %v1822_v2 }
 0x2a2   :  { %v1353_v60 = vrot.slane %v1338_v57, %v1822_v2  ;;  %v1361_v0 = vrot.slane %v1323_v53, %v1822_v2  ;;  %v1382_v3 = vadd.f32 %v1345_v58, %v1839_v34 }
 0x2a3   :  { %v1341_v4 = vcombine.high %v1337_v54, %v1337_v54  ;;  %v1357_v5 = vrot.slane %v1340_v56, %v1822_v2  ;;  %v1365_v63 = vrot.slane %v1337_v54, %v1822_v2  ;;  %v1369_v6 = vrot.slane %v1339_v55, %v1822_v2 }
 0x2a4   :  { %v1383_v10 = vadd.f32 %v1349_v59, %v1845_v40  ;;  %v1384_v25 = vadd.f32 %v1353_v60, %v1837_v33  ;;  %v1386_v11 = vadd.f32 %v1361_v0, %v1855_v50  ;;  %v1390_v50 = vsel %vm60_vm0, %v1382_v3, -inf }
 0x2a5   :  { %v1373_v7 = vrot.slane %v1341_v4, %v1822_v2  ;;  %v1385_v8 = vadd.f32 %v1357_v5, %v1843_v39  ;;  %v1387_v9 = vadd.f32 %v1365_v63, %v1853_v49  ;;  %v1388_v12 = vadd.f32 %v1369_v6, %v1869_v62 }
 0x2a6   :  { %v1391_v15 = vsel %vm60_vm0, %v1383_v10, -inf  ;;  %v1394_v34 = vsel %vm60_vm0, %v1386_v11, -inf  ;;  %v1392_v18 = vsel %vm60_vm0, %v1384_v25, -inf }
 0x2a7   :  { %v1389_v13 = vadd.f32 %v1373_v7, %v1867_v61  ;;  %v1396_v40 = vsel %vm60_vm0, %v1387_v9, -inf  ;;  %v1398_v33 = vsel %vm60_vm0, %v1388_v12, -inf  ;;  %v1393_v39 = vsel %vm60_vm0, %v1385_v8, -inf }
 0x2a8   :  { %v1397_v17 = vmax.f32 %v1391_v15, %v1396_v40  ;;  %v1395_v62 = vmax.f32 %v1390_v50, %v1394_v34  ;;  %v1399_v14 = vmax.f32 %v1392_v18, %v1398_v33 }
 0x2a9   :  { %v1400_v49 = vsel %vm60_vm0, %v1389_v13, -inf }
 0x2aa   :  { %v1401_v61 = vmax.f32 %v1393_v39, %v1400_v49  ;;  %v1402_v19 = vmax.f32 %v1395_v62, %v1397_v17 }
 0x2ac   :  { %v1403_v16 = vmax.f32 %v1399_v14, %v1401_v61 }
 0x2ae   :  { %v1404_v24 = vmax.f32 %v1402_v19, %v1403_v16 }
 0x2b0   :  { %v1405_v23 = vsub.f32 %v1382_v3, %v1404_v24  ;;  %v1406_v20 = vsub.f32 %v1383_v10, %v1404_v24  ;;  %v1407_v21 = vsub.f32 %v1384_v25, %v1404_v24  ;;  %v1408_v22 = vsub.f32 %v1385_v8, %v1404_v24  ;;  %v1291_v25 = vld [vmem:[#allocation6 + $0x7] sm:$0x1] }
 0x2b1   :  { %v1409_v26 = vsub.f32 %v1386_v11, %v1404_v24  ;;  %v1410_v31 = vsub.f32 %v1387_v9, %v1404_v24  ;;  %v1411_v35 = vsub.f32 %v1388_v12, %v1404_v24  ;;  %v1412_v36 = vsub.f32 %v1389_v13, %v1404_v24  ;;  %v1290_v12 = vld [vmem:[#allocation3 + $0x38] sm:$0xff] }
 0x2b2   :  { %v1413_v27 = vmul.f32 1.442695, %v1405_v23  ;;  %v1415_v28 = vmul.f32 1.442695, %v1406_v20  ;;  %v1417_v30 = vmul.f32 1.442695, %v1407_v21 }
 0x2b3   :  { %v1419_v32 = vmul.f32 1.442695, %v1408_v22  ;;  %v1421_v29 = vmul.f32 1.442695, %v1409_v26  ;;  %v1423_v42 = vmul.f32 1.442695, %v1410_v31 }
 0x2b4   :  { %1634 = vpow2.f32 %v1413_v27  ;;  %v1425_v37 = vmul.f32 1.442695, %v1411_v35  ;;  %v1427_v38 = vmul.f32 1.442695, %v1412_v36  ;;  %vm1448_vm1 = vcmp.gt.f32.partialorder %v1291_v25, 0.0 }
 0x2b5   :  { %1636 = vpow2.f32 %v1415_v28  ;;  %v1449_v11 = vsel %vm1448_vm1, 1, %v1757_v1 }
 0x2b6   :  { %1638 = vpow2.f32 %v1417_v30  ;;  %v1453_v8 = vrot.slane %v1449_v11, %v1822_v2 }
 0x2b7   :  { %1640 = vpow2.f32 %v1419_v32 }
 0x2b8   :  { %1642 = vpow2.f32 %v1421_v29  ;;  %vm1454_vm2 = vcmp.eq.s32.totalorder %v1453_v8, 1 }
 0x2b9   :  { %1644 = vpow2.f32 %v1423_v42 }
 0x2ba   :  { %1646 = vpow2.f32 %v1425_v37 }
 0x2bb   :  { %1648 = vpow2.f32 %v1427_v38 }
 0x2be   :  { %v1635_v41 = vpop.eup %1634 }
 0x2bf   :  { %v1637_v44 = vpop.eup %1636  ;;  %v1429_v45 = vsel %vm60_vm0, %v1635_v41, 0.0 }
 0x2c0   :  { %v1639_v47 = vpop.eup %1638  ;;  %v1430_v51 = vsel %vm60_vm0, %v1637_v44, 0.0 }
 0x2c1   :  { %v1641_v52 = vpop.eup %1640  ;;  %v1431_v46 = vadd.f32 %v1430_v51, %v1429_v45  ;;  %v1432_v53 = vsel %vm60_vm0, %v1639_v47, 0.0 }
 0x2c2   :  { %v1643_v48 = vpop.eup %1642  ;;  %v1434_v58 = vsel %vm60_vm0, %v1641_v52, 0.0 }
 0x2c3   :  { %v1433_v57 = vadd.f32 %v1432_v53, %v1431_v46  ;;  %v1645_v54 = vpop.eup %1644  ;;  %v1436_v56 = vsel %vm60_vm0, %v1643_v48, 0.0 }
 0x2c4   :  { %v1647_v59 = vpop.eup %1646  ;;  %v1438_v0 = vsel %vm60_vm0, %v1645_v54, 0.0 }
 0x2c5   :  { %v1435_v55 = vadd.f32 %v1434_v58, %v1433_v57  ;;  %v1649_v4 = vpop.eup %1648  ;;  %v1440_v63 = vsel %vm60_vm0, %v1647_v59, 0.0 }
 0x2c6   :  { %v1442_v3 = vsel %vm60_vm0, %v1649_v4, 0.0 }
 0x2c7   :  { %v1437_v60 = vadd.f32 %v1436_v56, %v1435_v55 }
 0x2c9   :  { %v1439_v5 = vadd.f32 %v1438_v0, %v1437_v60 }
 0x2cb   :  { %v1441_v6 = vadd.f32 %v1440_v63, %v1439_v5 }
 0x2cd   :  { %v1443_v10 = vadd.f32 %v1442_v3, %v1441_v6 }
 0x2cf   :  { %1650 = vlog2.f32 %v1443_v10 }
 0x2d9   :  { %v1651_v7 = vpop.eup %1650 }
 0x2da   :  { %v1445_v9 = vmul.f32 0.6931472, %v1651_v7 }
 0x2dc   :  { %v1446_v13 = vadd.f32 %v1445_v9, %v1404_v24 }
 0x2de   :  { %v1447_v15 = vadd.f32 %v1446_v13, %v1290_v12 }
 0x2e0   :  { %v1455_v34 = vsel %vm1454_vm2, %v1447_v15, %v2166_v43 }
 0x2e1   :  { %1456 = vst.msk [vmem:[#allocation2] sm:$0xff] %vm60_vm0, %v1455_v34  ;;  %v1460_v40 = vsel %vm60_vm0, %v1455_v34, -inf }
 0x2e2   :  { %v1461_v17 = vrot.slane %v1460_v40, 4 }
 0x2e4   :  { %v1462_v33 = vmax.f32 %v1460_v40, %v1461_v17 }
 0x2e6   :  { %v1463_v50 = vrot.slane %v1462_v33, 2 }
 0x2e8   :  { %v1464_v18 = vmax.f32 %v1462_v33, %v1463_v50 }
 0x2ea   :  { %v1465_v39 = vrot.slane %v1464_v18, 1 }
 0x2ec   :  { %v1466_v1 = vmax.f32 %v1464_v18, %v1465_v39 }
 0x2ee   :  { %v1467_v49 = vsub.f32 %v1455_v34, %v1466_v1 }
 0x2f0   :  { %v1468_v62 = vmul.f32 1.442695, %v1467_v49 }
 0x2f2   :  { %1652 = vpow2.f32 %v1468_v62 }
 0x2fc   :  { %v1653_v2 = vpop.eup %1652 }
 0x2fd   :  { %v1470_v14 = vsel %vm60_vm0, %v1653_v2, 0.0 }
 0x2fe   :  { %v1471_v61 = vrot.slane %v1470_v14, 4 }
 0x300   :  { %v1472_v19 = vadd.f32 %v1471_v61, %v1470_v14 }
 0x302   :  { %v1473_v16 = vrot.slane %v1472_v19, 2 }
 0x304   :  { %v1474_v43 = vadd.f32 %v1473_v16, %v1472_v19 }
 0x306   :  { %v1475_v24 = vrot.slane %v1474_v43, 1 }
 0x308   :  { %v1476_v23 = vadd.f32 %v1475_v24, %v1474_v43 }
 0x30a   :  { %1654 = vlog2.f32 %v1476_v23 }
 0x314   :  { %v1655_v20 = vpop.eup %1654 }
 0x315   :  { %v1478_v21 = vmul.f32 0.6931472, %v1655_v20 }
 0x317   :  { %v1479_v22 = vadd.f32 %v1478_v21, %v1466_v1 }
 0x319   :  { %1481 = vst.msk [vmem:[#allocation9] sm:$0x1] %vm1480_vm3, %v1479_v22 }
 0x31a   :  { %1733 = shalt.err (!%p1730_p0)
}
 0x31b   :  { %s1734_s26 = scalar_lea.hbm %s2230_s3, 16 }
 0x31c   :  { %p1735_p1 = scmp.ne.s32.totalorder %s2230_s3, %s1734_s26  ;;  %p1738_p2 = scmp.lt.u32.totalorder %s1734_s26, %s2230_s3 }
 0x31e   :  { %p1740_p3 = pnand %p1738_p2, %p1735_p1 }
 0x320   :  { %1743 = shalt.err (!%p1740_p3)
}
 0x321   :  { %1491 = dma.vmem_to_hbm [thread:$0]  %s1489_s21, 16, %s2230_s3, [#allocation5]  }
 0x322   :  { %1748 = dma.done.wait [#allocation5], 16  }
 0x323   :  { %1749 = vsyncadd [#allocation5], 4294967280 }
 0x324   :  { %1495 = vsyncpa [#allocation4], 1 }
 0x325   :  { %1496 = vsyncpa [#allocation7], 1 }
 0x326   :  { %1497 = vsyncpa [#allocation5], 1 }

</bundles_post_ra>
